<compile_context>
chip_gen: v7x
topology: tpu7x:2x2x1
jax: 0.10.0
libtpu: 0.0.40
codegen_flags: <defaults>
</compile_context>

<pallas_src>
import functools

import jax
import jax.numpy as jnp
import numpy as np
from jax.experimental import pallas as pl
from jax.experimental.pallas import tpu as pltpu

LANE = 128


def _round_up(x, m):
    return ((x + m - 1) // m) * m


def _pad_to(a, shape):
    """Zero-pad `a` (trailing padding per dim) up to `shape`."""
    pads = [(0, s - d) for d, s in zip(a.shape, shape)]
    return jnp.pad(a, pads)


# ----------------------------------------------------------------------------
# Fused kernel: 2-layer tanh RNN (unrolled over time) + window readout + MLP.
# ----------------------------------------------------------------------------
def fused_ts_kernel(x_ref, static_ref,
                    w1_ref, b1_ref, w2_ref, b2_ref,
                    w0_ref, b0_ref, w1m_ref, b1m_ref, wo_ref, bo_ref,
                    out_ref, *, seq_len, window_size, hidden_pad):
    Bb = static_ref.shape[0]
    HP = hidden_pad
    bf16 = jnp.bfloat16

    # Hoist bias broadcasts out of the unrolled time loop (no per-iter broadcast).
    b1 = jnp.broadcast_to(b1_ref[...], (Bb, HP))
    b2 = jnp.broadcast_to(b2_ref[...], (Bb, HP))

    # h1 lives in lanes [0,H); h2 lives pre-shifted in lanes [H,2H).
    h1 = jnp.zeros((Bb, HP), jnp.float32)
    h2 = jnp.zeros((Bb, HP), jnp.float32)
    window = []
    for t in range(seq_len):                      # fully unrolled recurrence
        x_t = x_ref[t]                            # (Bb, HP), x in lanes [H,H+D)
        # layer 1: K=128 push; packed input is a plain VPU add (disjoint lanes).
        p1 = (h1 + x_t).astype(bf16)
        h1 = jnp.tanh(
            jnp.dot(p1, w1_ref[...], preferred_element_type=jnp.float32) + b1)
        # layer 2: K=128 push; h2 is stored pre-shifted -> no concat, no roll.
        p2 = (h1 + h2).astype(bf16)
        h2 = jnp.tanh(
            jnp.dot(p2, w2_ref[...], preferred_element_type=jnp.float32) + b2)
        if t >= seq_len - window_size:
            window.append(h2)

    # Readout: fold static (lanes [0,n_static)) into window step 0 (lanes [H,2H))
    # with one add; w0 rows are reordered in the wrapper to match this layout.
    blk0 = window[0] + static_ref[...]
    if window_size == 1:
        feats = blk0
    else:
        feats = jnp.concatenate([blk0] + window[1:], axis=-1)

    # MLP: two ReLU hidden layers (bf16 operands, f32 accumulate) + f32 head.
    h = jnp.dot(feats.astype(bf16), w0_ref[...],
                preferred_element_type=jnp.float32) + b0_ref[...]
    h = jnp.maximum(h, 0.0)
    h = jnp.dot(h.astype(bf16), w1m_ref[...],
                preferred_element_type=jnp.float32) + b1m_ref[...]
    h = jnp.maximum(h, 0.0)
    out = jnp.dot(h, wo_ref[...], preferred_element_type=jnp.float32) + bo_ref[...]
    out_ref[...] = out.astype(out_ref.dtype)


# ----------------------------------------------------------------------------
# One-time parameter fusion / lane packing (run ONCE at init, outside the
# per-call jitted path).
# ----------------------------------------------------------------------------
def prepare_fused_params(params, n_static, window_size):
    rnn, mlp = params["rnn"], params["mlp"]
    D, H = rnn["wih1"].shape
    HP = _round_up(max(H + D, 2 * H), LANE)
    MH = mlp["w1"].shape[0]
    MP = _round_up(MH, LANE)
    n_out = mlp["w_out"].shape[1]
    OP = _round_up(n_out, LANE)
    f32 = jnp.float32

    assert H + D <= HP and 2 * H <= HP
    assert n_static <= H, "static fold into feats block 0 needs n_static <= hidden"

    # RNN layer 1: packed input = h1 (lanes [0,H)) + x_t (lanes [H,H+D)).
    w1 = jnp.zeros((HP, HP), f32)
    w1 = w1.at[0:H, 0:H].set(rnn["whh1"])
    w1 = w1.at[H:H + D, 0:H].set(rnn["wih1"])
    b1 = jnp.zeros((1, HP), f32).at[:, 0:H].set(rnn["b1"])

    # RNN layer 2: packed input = h1 (lanes [0,H)) + h2_shifted (lanes [H,2H));
    # output columns shifted to [H,2H) so h2 is stored pre-shifted.
    w2 = jnp.zeros((HP, HP), f32)
    w2 = w2.at[0:H, H:2 * H].set(rnn["wih2"])
    w2 = w2.at[H:2 * H, H:2 * H].set(rnn["whh2"])
    b2 = jnp.zeros((1, HP), f32).at[:, H:2 * H].set(rnn["b2"])

    # MLP layer 0: rows rearranged to the packed feats layout:
    #   block j (rows [j*HP, (j+1)*HP)): temporal rows at offset H;
    #   block 0 additionally carries the static rows at offset 0.
    w0 = mlp["w0"]
    w0f = jnp.zeros((HP * window_size, MP), f32)
    w0f = w0f.at[0:n_static, 0:MH].set(w0[0:n_static, :])
    for j in range(window_size):
        rows = w0[n_static + j * H: n_static + (j + 1) * H, :]
        w0f = w0f.at[j * HP + H: j * HP + 2 * H, 0:MH].set(rows)

    b0 = _pad_to(mlp["b0"], (1, MP))
    w1m = _pad_to(mlp["w1"], (MP, MP))
    b1m = _pad_to(mlp["b1"], (1, MP))
    wo = _pad_to(mlp["w_out"], (MP, OP))
    bo = _pad_to(mlp["b_out"], (1, OP))

    bf16 = jnp.bfloat16
    return dict(w1=w1.astype(bf16), b1=b1, w2=w2.astype(bf16), b2=b2,
                w0=w0f.astype(bf16), b0=b0, w1m=w1m.astype(bf16), b1m=b1m,
                wo=wo, bo=bo)


def _pick_batch_block(B):
    """>=2 sublane-aligned batch blocks when B >= 16 (dual-TC v7x), else 1 block."""
    if B < 16 or B % 8 != 0:
        return B
    best = 8
    for bb in range(8, B // 2 + 1, 8):
        if B % bb == 0:
            best = bb
    return best


def _full_spec(a):
    nd = a.ndim
    return pl.BlockSpec(a.shape, lambda i: (0,) * nd)


# ----------------------------------------------------------------------------
# TimeSeriesLayer forward (mode="RNN") — single kernel launch.
# ----------------------------------------------------------------------------
@functools.partial(jax.jit,
                   static_argnames=("window_size", "hidden_size", "n_units_out"))
def timeseries_layer_forward(static_data, temporal_data, fused, *,
                             window_size, hidden_size, n_units_out):
    B, S, D = temporal_data.shape
    n_static = static_data.shape[1]
    H = hidden_size
    HP = fused["w1"].shape[0]
    OP = fused["bo"].shape[1]

    # Single fused pad+transpose pass over x: (B,S,D) -> (S,B,HP) with the D
    # features pre-shifted into lanes [H, H+D) (zeros elsewhere).
    x_packed = jnp.pad(jnp.swapaxes(temporal_data.astype(jnp.float32), 0, 1),
                       ((0, 0), (0, 0), (H, HP - H - D)))
    # static pre-padded into lanes [0, n_static) of a HP-lane slab.
    static_packed = jnp.pad(static_data.astype(jnp.float32),
                            ((0, 0), (0, HP - n_static)))

    bb = _pick_batch_block(B)
    nb = B // bb

    kernel = functools.partial(fused_ts_kernel, seq_len=S,
                               window_size=window_size, hidden_pad=HP)

    out_padded = pl.pallas_call(
        kernel,
        out_shape=jax.ShapeDtypeStruct((B, OP), jnp.float32),
        grid=(nb,),
        in_specs=[
            pl.BlockSpec((S, bb, HP), lambda i: (0, i, 0)),
            pl.BlockSpec((bb, HP), lambda i: (i, 0)),
            _full_spec(fused["w1"]), _full_spec(fused["b1"]),
            _full_spec(fused["w2"]), _full_spec(fused["b2"]),
            _full_spec(fused["w0"]), _full_spec(fused["b0"]),
            _full_spec(fused["w1m"]), _full_spec(fused["b1m"]),
            _full_spec(fused["wo"]), _full_spec(fused["bo"]),
        ],
        out_specs=pl.BlockSpec((bb, OP), lambda i: (i, 0)),
        compiler_params=pltpu.CompilerParams(
            dimension_semantics=("parallel",)),   # batch blocks are independent
    )(x_packed, static_packed,
      fused["w1"], fused["b1"], fused["w2"], fused["b2"],
      fused["w0"], fused["b0"], fused["w1m"], fused["b1m"],
      fused["wo"], fused["bo"])

    return out_padded[:, :n_units_out]


# ----------------------------------------------------------------------------
# Deterministic parameter init (matching the nn.Module shapes)
# ----------------------------------------------------------------------------
def init_params(key, n_static, n_temporal_in, n_temporal_hidden, n_units_out,
                window_size, mlp_hidden=100):
    ks = jax.random.split(key, 12)
    H, D = n_temporal_hidden, n_temporal_in
    s = 1.0 / np.sqrt(H)

    def u(k, shape):
        return jax.random.uniform(k, shape, jnp.float32, -s, s)

    rnn = {
        # stored pre-transposed for x @ W; PyTorch biases b_ih + b_hh folded
        "wih1": u(ks[0], (D, H)),
        "whh1": u(ks[1], (H, H)),
        "b1":   u(ks[2], (1, H)) + u(ks[3], (1, H)),
        "wih2": u(ks[4], (H, H)),
        "whh2": u(ks[5], (H, H)),
        "b2":   u(ks[6], (1, H)) + u(ks[7], (1, H)),
    }

    n_in = n_static + H * window_size

    def lin(k, fan_in, fan_out):
        lim = 1.0 / np.sqrt(fan_in)
        kw, kb = jax.random.split(k)
        return (jax.random.uniform(kw, (fan_in, fan_out), jnp.float32, -lim, lim),
                jax.random.uniform(kb, (1, fan_out), jnp.float32, -lim, lim))

    w0, b0 = lin(ks[8], n_in, mlp_hidden)
    w1, b1 = lin(ks[9], mlp_hidden, mlp_hidden)
    wo, bo = lin(ks[10], mlp_hidden, n_units_out)
    mlp = {"w0": w0, "b0": b0, "w1": w1, "b1": b1, "w_out": wo, "b_out": bo}
    return {"rnn": rnn, "mlp": mlp}


# ----------------------------------------------------------------------------
# Pure-JAX reference (unfused, unpadded, full f32) for correctness check
# ----------------------------------------------------------------------------
def reference_forward(static_data, temporal_data, params, window_size):
    p = params["rnn"]
    B, S, D = temporal_data.shape
    H = p["whh1"].shape[0]

    def step(carry, x_t):
        h1, h2 = carry
        h1 = jnp.tanh(x_t @ p["wih1"] + h1 @ p["whh1"] + p["b1"])
        h2 = jnp.tanh(h1 @ p["wih2"] + h2 @ p["whh2"] + p["b2"])
        return (h1, h2), h2

    init = (jnp.zeros((B, H), jnp.float32), jnp.zeros((B, H), jnp.float32))
    _, outs = jax.lax.scan(step, init, jnp.transpose(temporal_data, (1, 0, 2)))
    x_interm = jnp.transpose(outs, (1, 0, 2))

    temporal_batch = x_interm[:, S - window_size:, :].reshape(B, H * window_size)
    batch = jnp.concatenate([static_data, temporal_batch], axis=1)
    m = params["mlp"]
    h = jnp.maximum(batch @ m["w0"] + m["b0"], 0.0)
    h = jnp.maximum(h @ m["w1"] + m["b1"], 0.0)
    return h @ m["w_out"] + m["b_out"]


if __name__ == "__main__":
    # Small config consistent with the module (mode="RNN", window_size=1)
    B = 8                      # batch (multiple of 8 -> full sublanes)
    S = 8                      # n_temporal_window / seq_len
    n_static_units_in = 4
    n_temporal_units_in = 8
    n_temporal_units_hidden = 32
    n_units_out = 3
    window_size = 1

    key = jax.random.PRNGKey(0)
    k_s, k_t, k_p = jax.random.split(key, 3)
    static_data = jax.random.normal(k_s, (B, n_static_units_in), jnp.float32)
    temporal_data = jax.random.normal(k_t, (B, S, n_temporal_units_in), jnp.float32)

    params = init_params(k_p, n_static_units_in, n_temporal_units_in,
                         n_temporal_units_hidden, n_units_out, window_size)

    # Weight packing runs ONCE here (not inside the per-call jitted forward).
    fused = prepare_fused_params(params, n_static_units_in, window_size)

    out = timeseries_layer_forward(static_data, temporal_data, fused,
                                   window_size=window_size,
                                   hidden_size=n_temporal_units_hidden,
                                   n_units_out=n_units_out)
    out = jax.block_until_ready(out)

    ref = reference_forward(static_data, temporal_data, params, window_size)
    # bf16 MXU operands (f32 accumulate) on the recurrence / MLP hidden layers
    # -> tolerance loosened vs the pure-f32 reference, per review guidance.
    np.testing.assert_allclose(np.asarray(out), np.asarray(ref),
                               rtol=2e-2, atol=2e-2)
    assert out.shape == (B, n_units_out)
    assert not bool(jnp.isnan(out).any())

    print("KERNEL_OK")
</pallas_src>

<mosaic_0001>
module attributes {stable_mosaic.version = 11 : i64} {
  func.func @fused_ts_kernel(%arg0: i32, %arg1: memref<8x8x128xf32, #tpu.memory_space<vmem>>, %arg2: memref<8x128xf32, #tpu.memory_space<vmem>>, %arg3: memref<128x128xbf16, #tpu.memory_space<vmem>>, %arg4: memref<1x128xf32, #tpu.memory_space<vmem>>, %arg5: memref<128x128xbf16, #tpu.memory_space<vmem>>, %arg6: memref<1x128xf32, #tpu.memory_space<vmem>>, %arg7: memref<128x128xbf16, #tpu.memory_space<vmem>>, %arg8: memref<1x128xf32, #tpu.memory_space<vmem>>, %arg9: memref<128x128xbf16, #tpu.memory_space<vmem>>, %arg10: memref<1x128xf32, #tpu.memory_space<vmem>>, %arg11: memref<128x128xf32, #tpu.memory_space<vmem>>, %arg12: memref<1x128xf32, #tpu.memory_space<vmem>>, %arg13: memref<8x128xf32, #tpu.memory_space<vmem>>) attributes {dimension_semantics = [#tpu.dimension_semantics<parallel>], iteration_bounds = array<i64: 1>, scalar_prefetch = 0 : i64, scratch_operands = 0 : i64, tpu.core_type = #tpu.core_type<tc>, window_params = [{transform_indices = @transform_0, window_bounds = array<i64: 8, 8, 128>}, {transform_indices = @transform_1, window_bounds = array<i64: 8, 128>}, {pipeline_mode = #tpu.pipeline_mode<synchronous>, transform_indices = @transform_2, window_bounds = array<i64: 128, 128>}, {pipeline_mode = #tpu.pipeline_mode<synchronous>, transform_indices = @transform_3, window_bounds = array<i64: 1, 128>}, {pipeline_mode = #tpu.pipeline_mode<synchronous>, transform_indices = @transform_4, window_bounds = array<i64: 128, 128>}, {pipeline_mode = #tpu.pipeline_mode<synchronous>, transform_indices = @transform_5, window_bounds = array<i64: 1, 128>}, {pipeline_mode = #tpu.pipeline_mode<synchronous>, transform_indices = @transform_6, window_bounds = array<i64: 128, 128>}, {pipeline_mode = #tpu.pipeline_mode<synchronous>, transform_indices = @transform_7, window_bounds = array<i64: 1, 128>}, {pipeline_mode = #tpu.pipeline_mode<synchronous>, transform_indices = @transform_8, window_bounds = array<i64: 128, 128>}, {pipeline_mode = #tpu.pipeline_mode<synchronous>, transform_indices = @transform_9, window_bounds = array<i64: 1, 128>}, {pipeline_mode = #tpu.pipeline_mode<synchronous>, transform_indices = @transform_10, window_bounds = array<i64: 128, 128>}, {pipeline_mode = #tpu.pipeline_mode<synchronous>, transform_indices = @transform_11, window_bounds = array<i64: 1, 128>}, {transform_indices = @transform_12, window_bounds = array<i64: 8, 128>}]} {
    %c0 = arith.constant 0 : index
    %c0_0 = arith.constant 0 : index
    %0 = vector.load %arg4[%c0, %c0_0] : memref<1x128xf32, #tpu.memory_space<vmem>>, vector<1x128xf32>
    %1 = vector.shape_cast %0 : vector<1x128xf32> to vector<1x128xf32>
    %2 = vector.broadcast %1 : vector<1x128xf32> to vector<8x128xf32>
    %c0_1 = arith.constant 0 : index
    %c0_2 = arith.constant 0 : index
    %3 = vector.load %arg6[%c0_1, %c0_2] : memref<1x128xf32, #tpu.memory_space<vmem>>, vector<1x128xf32>
    %4 = vector.shape_cast %3 : vector<1x128xf32> to vector<1x128xf32>
    %5 = vector.broadcast %4 : vector<1x128xf32> to vector<8x128xf32>
    %cst = arith.constant 0.000000e+00 : f32
    %6 = vector.broadcast %cst : f32 to vector<8x128xf32>
    %cst_3 = arith.constant 0.000000e+00 : f32
    %7 = vector.broadcast %cst_3 : f32 to vector<8x128xf32>
    %c0_4 = arith.constant 0 : index
    %c0_5 = arith.constant 0 : index
    %c0_6 = arith.constant 0 : index
    %8 = vector.load %arg1[%c0_4, %c0_5, %c0_6] : memref<8x8x128xf32, #tpu.memory_space<vmem>>, vector<1x8x128xf32>
    %9 = vector.shape_cast %8 : vector<1x8x128xf32> to vector<8x128xf32>
    %10 = arith.addf %6, %9 : vector<8x128xf32>
    %11 = arith.truncf %10 : vector<8x128xf32> to vector<8x128xbf16>
    %c0_7 = arith.constant 0 : index
    %c0_8 = arith.constant 0 : index
    %12 = vector.load %arg3[%c0_7, %c0_8] : memref<128x128xbf16, #tpu.memory_space<vmem>>, vector<128x128xbf16>
    %cst_9 = arith.constant dense<0.000000e+00> : vector<8x128xf32>
    %13 = tpu.matmul %11, %12, %cst_9 {dimension_numbers = #tpu.dot_dimension_numbers<[1], [0], [0], [1], [0, 0, 1, 1], [], []>} : vector<8x128xbf16>, vector<128x128xbf16>, vector<8x128xf32> -> vector<8x128xf32>
    %14 = arith.addf %13, %2 : vector<8x128xf32>
    %15 = math.tanh %14 : vector<8x128xf32>
    %16 = arith.addf %15, %7 : vector<8x128xf32>
    %17 = arith.truncf %16 : vector<8x128xf32> to vector<8x128xbf16>
    %c0_10 = arith.constant 0 : index
    %c0_11 = arith.constant 0 : index
    %18 = vector.load %arg5[%c0_10, %c0_11] : memref<128x128xbf16, #tpu.memory_space<vmem>>, vector<128x128xbf16>
    %cst_12 = arith.constant dense<0.000000e+00> : vector<8x128xf32>
    %19 = tpu.matmul %17, %18, %cst_12 {dimension_numbers = #tpu.dot_dimension_numbers<[1], [0], [0], [1], [0, 0, 1, 1], [], []>} : vector<8x128xbf16>, vector<128x128xbf16>, vector<8x128xf32> -> vector<8x128xf32>
    %20 = arith.addf %19, %5 : vector<8x128xf32>
    %21 = math.tanh %20 : vector<8x128xf32>
    %c1 = arith.constant 1 : index
    %c0_13 = arith.constant 0 : index
    %c0_14 = arith.constant 0 : index
    %22 = vector.load %arg1[%c1, %c0_13, %c0_14] : memref<8x8x128xf32, #tpu.memory_space<vmem>>, vector<1x8x128xf32>
    %23 = vector.shape_cast %22 : vector<1x8x128xf32> to vector<8x128xf32>
    %24 = arith.addf %15, %23 : vector<8x128xf32>
    %25 = arith.truncf %24 : vector<8x128xf32> to vector<8x128xbf16>
    %c0_15 = arith.constant 0 : index
    %c0_16 = arith.constant 0 : index
    %26 = vector.load %arg3[%c0_15, %c0_16] : memref<128x128xbf16, #tpu.memory_space<vmem>>, vector<128x128xbf16>
    %cst_17 = arith.constant dense<0.000000e+00> : vector<8x128xf32>
    %27 = tpu.matmul %25, %26, %cst_17 {dimension_numbers = #tpu.dot_dimension_numbers<[1], [0], [0], [1], [0, 0, 1, 1], [], []>} : vector<8x128xbf16>, vector<128x128xbf16>, vector<8x128xf32> -> vector<8x128xf32>
    %28 = arith.addf %27, %2 : vector<8x128xf32>
    %29 = math.tanh %28 : vector<8x128xf32>
    %30 = arith.addf %29, %21 : vector<8x128xf32>
    %31 = arith.truncf %30 : vector<8x128xf32> to vector<8x128xbf16>
    %c0_18 = arith.constant 0 : index
    %c0_19 = arith.constant 0 : index
    %32 = vector.load %arg5[%c0_18, %c0_19] : memref<128x128xbf16, #tpu.memory_space<vmem>>, vector<128x128xbf16>
    %cst_20 = arith.constant dense<0.000000e+00> : vector<8x128xf32>
    %33 = tpu.matmul %31, %32, %cst_20 {dimension_numbers = #tpu.dot_dimension_numbers<[1], [0], [0], [1], [0, 0, 1, 1], [], []>} : vector<8x128xbf16>, vector<128x128xbf16>, vector<8x128xf32> -> vector<8x128xf32>
    %34 = arith.addf %33, %5 : vector<8x128xf32>
    %35 = math.tanh %34 : vector<8x128xf32>
    %c2 = arith.constant 2 : index
    %c0_21 = arith.constant 0 : index
    %c0_22 = arith.constant 0 : index
    %36 = vector.load %arg1[%c2, %c0_21, %c0_22] : memref<8x8x128xf32, #tpu.memory_space<vmem>>, vector<1x8x128xf32>
    %37 = vector.shape_cast %36 : vector<1x8x128xf32> to vector<8x128xf32>
    %38 = arith.addf %29, %37 : vector<8x128xf32>
    %39 = arith.truncf %38 : vector<8x128xf32> to vector<8x128xbf16>
    %c0_23 = arith.constant 0 : index
    %c0_24 = arith.constant 0 : index
    %40 = vector.load %arg3[%c0_23, %c0_24] : memref<128x128xbf16, #tpu.memory_space<vmem>>, vector<128x128xbf16>
    %cst_25 = arith.constant dense<0.000000e+00> : vector<8x128xf32>
    %41 = tpu.matmul %39, %40, %cst_25 {dimension_numbers = #tpu.dot_dimension_numbers<[1], [0], [0], [1], [0, 0, 1, 1], [], []>} : vector<8x128xbf16>, vector<128x128xbf16>, vector<8x128xf32> -> vector<8x128xf32>
    %42 = arith.addf %41, %2 : vector<8x128xf32>
    %43 = math.tanh %42 : vector<8x128xf32>
    %44 = arith.addf %43, %35 : vector<8x128xf32>
    %45 = arith.truncf %44 : vector<8x128xf32> to vector<8x128xbf16>
    %c0_26 = arith.constant 0 : index
    %c0_27 = arith.constant 0 : index
    %46 = vector.load %arg5[%c0_26, %c0_27] : memref<128x128xbf16, #tpu.memory_space<vmem>>, vector<128x128xbf16>
    %cst_28 = arith.constant dense<0.000000e+00> : vector<8x128xf32>
    %47 = tpu.matmul %45, %46, %cst_28 {dimension_numbers = #tpu.dot_dimension_numbers<[1], [0], [0], [1], [0, 0, 1, 1], [], []>} : vector<8x128xbf16>, vector<128x128xbf16>, vector<8x128xf32> -> vector<8x128xf32>
    %48 = arith.addf %47, %5 : vector<8x128xf32>
    %49 = math.tanh %48 : vector<8x128xf32>
    %c3 = arith.constant 3 : index
    %c0_29 = arith.constant 0 : index
    %c0_30 = arith.constant 0 : index
    %50 = vector.load %arg1[%c3, %c0_29, %c0_30] : memref<8x8x128xf32, #tpu.memory_space<vmem>>, vector<1x8x128xf32>
    %51 = vector.shape_cast %50 : vector<1x8x128xf32> to vector<8x128xf32>
    %52 = arith.addf %43, %51 : vector<8x128xf32>
    %53 = arith.truncf %52 : vector<8x128xf32> to vector<8x128xbf16>
    %c0_31 = arith.constant 0 : index
    %c0_32 = arith.constant 0 : index
    %54 = vector.load %arg3[%c0_31, %c0_32] : memref<128x128xbf16, #tpu.memory_space<vmem>>, vector<128x128xbf16>
    %cst_33 = arith.constant dense<0.000000e+00> : vector<8x128xf32>
    %55 = tpu.matmul %53, %54, %cst_33 {dimension_numbers = #tpu.dot_dimension_numbers<[1], [0], [0], [1], [0, 0, 1, 1], [], []>} : vector<8x128xbf16>, vector<128x128xbf16>, vector<8x128xf32> -> vector<8x128xf32>
    %56 = arith.addf %55, %2 : vector<8x128xf32>
    %57 = math.tanh %56 : vector<8x128xf32>
    %58 = arith.addf %57, %49 : vector<8x128xf32>
    %59 = arith.truncf %58 : vector<8x128xf32> to vector<8x128xbf16>
    %c0_34 = arith.constant 0 : index
    %c0_35 = arith.constant 0 : index
    %60 = vector.load %arg5[%c0_34, %c0_35] : memref<128x128xbf16, #tpu.memory_space<vmem>>, vector<128x128xbf16>
    %cst_36 = arith.constant dense<0.000000e+00> : vector<8x128xf32>
    %61 = tpu.matmul %59, %60, %cst_36 {dimension_numbers = #tpu.dot_dimension_numbers<[1], [0], [0], [1], [0, 0, 1, 1], [], []>} : vector<8x128xbf16>, vector<128x128xbf16>, vector<8x128xf32> -> vector<8x128xf32>
    %62 = arith.addf %61, %5 : vector<8x128xf32>
    %63 = math.tanh %62 : vector<8x128xf32>
    %c4 = arith.constant 4 : index
    %c0_37 = arith.constant 0 : index
    %c0_38 = arith.constant 0 : index
    %64 = vector.load %arg1[%c4, %c0_37, %c0_38] : memref<8x8x128xf32, #tpu.memory_space<vmem>>, vector<1x8x128xf32>
    %65 = vector.shape_cast %64 : vector<1x8x128xf32> to vector<8x128xf32>
    %66 = arith.addf %57, %65 : vector<8x128xf32>
    %67 = arith.truncf %66 : vector<8x128xf32> to vector<8x128xbf16>
    %c0_39 = arith.constant 0 : index
    %c0_40 = arith.constant 0 : index
    %68 = vector.load %arg3[%c0_39, %c0_40] : memref<128x128xbf16, #tpu.memory_space<vmem>>, vector<128x128xbf16>
    %cst_41 = arith.constant dense<0.000000e+00> : vector<8x128xf32>
    %69 = tpu.matmul %67, %68, %cst_41 {dimension_numbers = #tpu.dot_dimension_numbers<[1], [0], [0], [1], [0, 0, 1, 1], [], []>} : vector<8x128xbf16>, vector<128x128xbf16>, vector<8x128xf32> -> vector<8x128xf32>
    %70 = arith.addf %69, %2 : vector<8x128xf32>
    %71 = math.tanh %70 : vector<8x128xf32>
    %72 = arith.addf %71, %63 : vector<8x128xf32>
    %73 = arith.truncf %72 : vector<8x128xf32> to vector<8x128xbf16>
    %c0_42 = arith.constant 0 : index
    %c0_43 = arith.constant 0 : index
    %74 = vector.load %arg5[%c0_42, %c0_43] : memref<128x128xbf16, #tpu.memory_space<vmem>>, vector<128x128xbf16>
    %cst_44 = arith.constant dense<0.000000e+00> : vector<8x128xf32>
    %75 = tpu.matmul %73, %74, %cst_44 {dimension_numbers = #tpu.dot_dimension_numbers<[1], [0], [0], [1], [0, 0, 1, 1], [], []>} : vector<8x128xbf16>, vector<128x128xbf16>, vector<8x128xf32> -> vector<8x128xf32>
    %76 = arith.addf %75, %5 : vector<8x128xf32>
    %77 = math.tanh %76 : vector<8x128xf32>
    %c5 = arith.constant 5 : index
    %c0_45 = arith.constant 0 : index
    %c0_46 = arith.constant 0 : index
    %78 = vector.load %arg1[%c5, %c0_45, %c0_46] : memref<8x8x128xf32, #tpu.memory_space<vmem>>, vector<1x8x128xf32>
    %79 = vector.shape_cast %78 : vector<1x8x128xf32> to vector<8x128xf32>
    %80 = arith.addf %71, %79 : vector<8x128xf32>
    %81 = arith.truncf %80 : vector<8x128xf32> to vector<8x128xbf16>
    %c0_47 = arith.constant 0 : index
    %c0_48 = arith.constant 0 : index
    %82 = vector.load %arg3[%c0_47, %c0_48] : memref<128x128xbf16, #tpu.memory_space<vmem>>, vector<128x128xbf16>
    %cst_49 = arith.constant dense<0.000000e+00> : vector<8x128xf32>
    %83 = tpu.matmul %81, %82, %cst_49 {dimension_numbers = #tpu.dot_dimension_numbers<[1], [0], [0], [1], [0, 0, 1, 1], [], []>} : vector<8x128xbf16>, vector<128x128xbf16>, vector<8x128xf32> -> vector<8x128xf32>
    %84 = arith.addf %83, %2 : vector<8x128xf32>
    %85 = math.tanh %84 : vector<8x128xf32>
    %86 = arith.addf %85, %77 : vector<8x128xf32>
    %87 = arith.truncf %86 : vector<8x128xf32> to vector<8x128xbf16>
    %c0_50 = arith.constant 0 : index
    %c0_51 = arith.constant 0 : index
    %88 = vector.load %arg5[%c0_50, %c0_51] : memref<128x128xbf16, #tpu.memory_space<vmem>>, vector<128x128xbf16>
    %cst_52 = arith.constant dense<0.000000e+00> : vector<8x128xf32>
    %89 = tpu.matmul %87, %88, %cst_52 {dimension_numbers = #tpu.dot_dimension_numbers<[1], [0], [0], [1], [0, 0, 1, 1], [], []>} : vector<8x128xbf16>, vector<128x128xbf16>, vector<8x128xf32> -> vector<8x128xf32>
    %90 = arith.addf %89, %5 : vector<8x128xf32>
    %91 = math.tanh %90 : vector<8x128xf32>
    %c6 = arith.constant 6 : index
    %c0_53 = arith.constant 0 : index
    %c0_54 = arith.constant 0 : index
    %92 = vector.load %arg1[%c6, %c0_53, %c0_54] : memref<8x8x128xf32, #tpu.memory_space<vmem>>, vector<1x8x128xf32>
    %93 = vector.shape_cast %92 : vector<1x8x128xf32> to vector<8x128xf32>
    %94 = arith.addf %85, %93 : vector<8x128xf32>
    %95 = arith.truncf %94 : vector<8x128xf32> to vector<8x128xbf16>
    %c0_55 = arith.constant 0 : index
    %c0_56 = arith.constant 0 : index
    %96 = vector.load %arg3[%c0_55, %c0_56] : memref<128x128xbf16, #tpu.memory_space<vmem>>, vector<128x128xbf16>
    %cst_57 = arith.constant dense<0.000000e+00> : vector<8x128xf32>
    %97 = tpu.matmul %95, %96, %cst_57 {dimension_numbers = #tpu.dot_dimension_numbers<[1], [0], [0], [1], [0, 0, 1, 1], [], []>} : vector<8x128xbf16>, vector<128x128xbf16>, vector<8x128xf32> -> vector<8x128xf32>
    %98 = arith.addf %97, %2 : vector<8x128xf32>
    %99 = math.tanh %98 : vector<8x128xf32>
    %100 = arith.addf %99, %91 : vector<8x128xf32>
    %101 = arith.truncf %100 : vector<8x128xf32> to vector<8x128xbf16>
    %c0_58 = arith.constant 0 : index
    %c0_59 = arith.constant 0 : index
    %102 = vector.load %arg5[%c0_58, %c0_59] : memref<128x128xbf16, #tpu.memory_space<vmem>>, vector<128x128xbf16>
    %cst_60 = arith.constant dense<0.000000e+00> : vector<8x128xf32>
    %103 = tpu.matmul %101, %102, %cst_60 {dimension_numbers = #tpu.dot_dimension_numbers<[1], [0], [0], [1], [0, 0, 1, 1], [], []>} : vector<8x128xbf16>, vector<128x128xbf16>, vector<8x128xf32> -> vector<8x128xf32>
    %104 = arith.addf %103, %5 : vector<8x128xf32>
    %105 = math.tanh %104 : vector<8x128xf32>
    %c7 = arith.constant 7 : index
    %c0_61 = arith.constant 0 : index
    %c0_62 = arith.constant 0 : index
    %106 = vector.load %arg1[%c7, %c0_61, %c0_62] : memref<8x8x128xf32, #tpu.memory_space<vmem>>, vector<1x8x128xf32>
    %107 = vector.shape_cast %106 : vector<1x8x128xf32> to vector<8x128xf32>
    %108 = arith.addf %99, %107 : vector<8x128xf32>
    %109 = arith.truncf %108 : vector<8x128xf32> to vector<8x128xbf16>
    %c0_63 = arith.constant 0 : index
    %c0_64 = arith.constant 0 : index
    %110 = vector.load %arg3[%c0_63, %c0_64] : memref<128x128xbf16, #tpu.memory_space<vmem>>, vector<128x128xbf16>
    %cst_65 = arith.constant dense<0.000000e+00> : vector<8x128xf32>
    %111 = tpu.matmul %109, %110, %cst_65 {dimension_numbers = #tpu.dot_dimension_numbers<[1], [0], [0], [1], [0, 0, 1, 1], [], []>} : vector<8x128xbf16>, vector<128x128xbf16>, vector<8x128xf32> -> vector<8x128xf32>
    %112 = arith.addf %111, %2 : vector<8x128xf32>
    %113 = math.tanh %112 : vector<8x128xf32>
    %114 = arith.addf %113, %105 : vector<8x128xf32>
    %115 = arith.truncf %114 : vector<8x128xf32> to vector<8x128xbf16>
    %c0_66 = arith.constant 0 : index
    %c0_67 = arith.constant 0 : index
    %116 = vector.load %arg5[%c0_66, %c0_67] : memref<128x128xbf16, #tpu.memory_space<vmem>>, vector<128x128xbf16>
    %cst_68 = arith.constant dense<0.000000e+00> : vector<8x128xf32>
    %117 = tpu.matmul %115, %116, %cst_68 {dimension_numbers = #tpu.dot_dimension_numbers<[1], [0], [0], [1], [0, 0, 1, 1], [], []>} : vector<8x128xbf16>, vector<128x128xbf16>, vector<8x128xf32> -> vector<8x128xf32>
    %118 = arith.addf %117, %5 : vector<8x128xf32>
    %119 = math.tanh %118 : vector<8x128xf32>
    %c0_69 = arith.constant 0 : index
    %c0_70 = arith.constant 0 : index
    %120 = vector.load %arg2[%c0_69, %c0_70] : memref<8x128xf32, #tpu.memory_space<vmem>>, vector<8x128xf32>
    %121 = arith.addf %119, %120 : vector<8x128xf32>
    %122 = arith.truncf %121 : vector<8x128xf32> to vector<8x128xbf16>
    %c0_71 = arith.constant 0 : index
    %c0_72 = arith.constant 0 : index
    %123 = vector.load %arg7[%c0_71, %c0_72] : memref<128x128xbf16, #tpu.memory_space<vmem>>, vector<128x128xbf16>
    %cst_73 = arith.constant dense<0.000000e+00> : vector<8x128xf32>
    %124 = tpu.matmul %122, %123, %cst_73 {dimension_numbers = #tpu.dot_dimension_numbers<[1], [0], [0], [1], [0, 0, 1, 1], [], []>} : vector<8x128xbf16>, vector<128x128xbf16>, vector<8x128xf32> -> vector<8x128xf32>
    %c0_74 = arith.constant 0 : index
    %c0_75 = arith.constant 0 : index
    %125 = vector.load %arg8[%c0_74, %c0_75] : memref<1x128xf32, #tpu.memory_space<vmem>>, vector<1x128xf32>
    %126 = vector.broadcast %125 : vector<1x128xf32> to vector<8x128xf32>
    %127 = arith.addf %124, %126 : vector<8x128xf32>
    %cst_76 = arith.constant 0.000000e+00 : f32
    %128 = vector.broadcast %cst_76 : f32 to vector<8x128xf32>
    %129 = arith.maximumf %127, %128 : vector<8x128xf32>
    %130 = arith.truncf %129 : vector<8x128xf32> to vector<8x128xbf16>
    %c0_77 = arith.constant 0 : index
    %c0_78 = arith.constant 0 : index
    %131 = vector.load %arg9[%c0_77, %c0_78] : memref<128x128xbf16, #tpu.memory_space<vmem>>, vector<128x128xbf16>
    %cst_79 = arith.constant dense<0.000000e+00> : vector<8x128xf32>
    %132 = tpu.matmul %130, %131, %cst_79 {dimension_numbers = #tpu.dot_dimension_numbers<[1], [0], [0], [1], [0, 0, 1, 1], [], []>} : vector<8x128xbf16>, vector<128x128xbf16>, vector<8x128xf32> -> vector<8x128xf32>
    %c0_80 = arith.constant 0 : index
    %c0_81 = arith.constant 0 : index
    %133 = vector.load %arg10[%c0_80, %c0_81] : memref<1x128xf32, #tpu.memory_space<vmem>>, vector<1x128xf32>
    %134 = vector.broadcast %133 : vector<1x128xf32> to vector<8x128xf32>
    %135 = arith.addf %132, %134 : vector<8x128xf32>
    %cst_82 = arith.constant 0.000000e+00 : f32
    %136 = vector.broadcast %cst_82 : f32 to vector<8x128xf32>
    %137 = arith.maximumf %135, %136 : vector<8x128xf32>
    %c0_83 = arith.constant 0 : index
    %c0_84 = arith.constant 0 : index
    %138 = vector.load %arg11[%c0_83, %c0_84] : memref<128x128xf32, #tpu.memory_space<vmem>>, vector<128x128xf32>
    %cst_85 = arith.constant dense<0.000000e+00> : vector<8x128xf32>
    %139 = tpu.matmul %137, %138, %cst_85 {dimension_numbers = #tpu.dot_dimension_numbers<[1], [0], [0], [1], [0, 0, 1, 1], [], []>} : vector<8x128xf32>, vector<128x128xf32>, vector<8x128xf32> -> vector<8x128xf32>
    %c0_86 = arith.constant 0 : index
    %c0_87 = arith.constant 0 : index
    %140 = vector.load %arg12[%c0_86, %c0_87] : memref<1x128xf32, #tpu.memory_space<vmem>>, vector<1x128xf32>
    %141 = vector.broadcast %140 : vector<1x128xf32> to vector<8x128xf32>
    %142 = arith.addf %139, %141 : vector<8x128xf32>
    %c0_88 = arith.constant 0 : index
    %c0_89 = arith.constant 0 : index
    %143 = vector.load %arg13[%c0_88, %c0_89] : memref<8x128xf32, #tpu.memory_space<vmem>>, vector<8x128xf32>
    tpu.vector_store %arg13[%c0_88, %c0_89], %142 {strides = array<i32>} : memref<8x128xf32, #tpu.memory_space<vmem>>, vector<8x128xf32>,
    return
  }
  func.func @transform_0(%arg0: i32) -> (i32, i32, i32) {
    %c0_i32 = arith.constant 0 : i32
    %c0_i32_0 = arith.constant 0 : i32
    %c0_i32_1 = arith.constant 0 : i32
    return %c0_i32, %arg0, %c0_i32_0 : i32, i32, i32
  }
  func.func @transform_1(%arg0: i32) -> (i32, i32) {
    %c0_i32 = arith.constant 0 : i32
    %c0_i32_0 = arith.constant 0 : i32
    return %arg0, %c0_i32 : i32, i32
  }
  func.func @transform_2(%arg0: i32) -> (i32, i32) {
    %c0_i32 = arith.constant 0 : i32
    %c0_i32_0 = arith.constant 0 : i32
    %c0_i32_1 = arith.constant 0 : i32
    return %c0_i32, %c0_i32_0 : i32, i32
  }
  func.func @transform_3(%arg0: i32) -> (i32, i32) {
    %c0_i32 = arith.constant 0 : i32
    %c0_i32_0 = arith.constant 0 : i32
    %c0_i32_1 = arith.constant 0 : i32
    return %c0_i32, %c0_i32_0 : i32, i32
  }
  func.func @transform_4(%arg0: i32) -> (i32, i32) {
    %c0_i32 = arith.constant 0 : i32
    %c0_i32_0 = arith.constant 0 : i32
    %c0_i32_1 = arith.constant 0 : i32
    return %c0_i32, %c0_i32_0 : i32, i32
  }
  func.func @transform_5(%arg0: i32) -> (i32, i32) {
    %c0_i32 = arith.constant 0 : i32
    %c0_i32_0 = arith.constant 0 : i32
    %c0_i32_1 = arith.constant 0 : i32
    return %c0_i32, %c0_i32_0 : i32, i32
  }
  func.func @transform_6(%arg0: i32) -> (i32, i32) {
    %c0_i32 = arith.constant 0 : i32
    %c0_i32_0 = arith.constant 0 : i32
    %c0_i32_1 = arith.constant 0 : i32
    return %c0_i32, %c0_i32_0 : i32, i32
  }
  func.func @transform_7(%arg0: i32) -> (i32, i32) {
    %c0_i32 = arith.constant 0 : i32
    %c0_i32_0 = arith.constant 0 : i32
    %c0_i32_1 = arith.constant 0 : i32
    return %c0_i32, %c0_i32_0 : i32, i32
  }
  func.func @transform_8(%arg0: i32) -> (i32, i32) {
    %c0_i32 = arith.constant 0 : i32
    %c0_i32_0 = arith.constant 0 : i32
    %c0_i32_1 = arith.constant 0 : i32
    return %c0_i32, %c0_i32_0 : i32, i32
  }
  func.func @transform_9(%arg0: i32) -> (i32, i32) {
    %c0_i32 = arith.constant 0 : i32
    %c0_i32_0 = arith.constant 0 : i32
    %c0_i32_1 = arith.constant 0 : i32
    return %c0_i32, %c0_i32_0 : i32, i32
  }
  func.func @transform_10(%arg0: i32) -> (i32, i32) {
    %c0_i32 = arith.constant 0 : i32
    %c0_i32_0 = arith.constant 0 : i32
    %c0_i32_1 = arith.constant 0 : i32
    return %c0_i32, %c0_i32_0 : i32, i32
  }
  func.func @transform_11(%arg0: i32) -> (i32, i32) {
    %c0_i32 = arith.constant 0 : i32
    %c0_i32_0 = arith.constant 0 : i32
    %c0_i32_1 = arith.constant 0 : i32
    return %c0_i32, %c0_i32_0 : i32, i32
  }
  func.func @transform_12(%arg0: i32) -> (i32, i32) {
    %c0_i32 = arith.constant 0 : i32
    %c0_i32_0 = arith.constant 0 : i32
    return %arg0, %c0_i32 : i32, i32
  }
}

</mosaic_0001>

<bundles_post_ra>
// kernel: timeseries_layer_forward.1
= control target key start
LH: loop header
LB: loop body
LE: loop exit
PB: predicated region body
PF: predicated region fallthrough
CT: control target
= control target key end

     0   :  { %17 = vsyncpa [#allocation3], 0  ;;  %s2603_s0 = inlined_call_operand.vmem [shape: f32[8,8,128], index: 0, kind: input, shape index: {}]   ;;  %s2604_s1 = inlined_call_operand.vmem [shape: f32[8,128], index: 1, kind: input, shape index: {}]   ;;  %s2605_s2 = inlined_call_operand.vmem [shape: bf16[128,128], index: 2, kind: input, shape index: {}]   ;;  %s2606_s3 = inlined_call_operand.vmem [shape: f32[1,128], index: 3, kind: input, shape index: {}]   ;;  %s2607_s4 = inlined_call_operand.vmem [shape: bf16[128,128], index: 4, kind: input, shape index: {}]   ;;  %s2608_s5 = inlined_call_operand.vmem [shape: f32[1,128], index: 5, kind: input, shape index: {}]   ;;  %s2609_s6 = inlined_call_operand.hbm [shape: bf16[128,128], index: 6, kind: input, shape index: {}]   ;;  %s2610_s7 = inlined_call_operand.vmem [shape: f32[1,128], index: 7, kind: input, shape index: {}]   ;;  %s2611_s8 = inlined_call_operand.hbm [shape: bf16[128,128], index: 8, kind: input, shape index: {}]   ;;  %s2612_s9 = inlined_call_operand.vmem [shape: f32[1,128], index: 9, kind: input, shape index: {}]   ;;  %s2613_s10 = inlined_call_operand.vmem [shape: f32[128,128], index: 10, kind: input, shape index: {}]   ;;  %s2614_s11 = inlined_call_operand.vmem [shape: f32[1,128], index: 11, kind: input, shape index: {}]   ;;  %s2615_s12 = inlined_call_operand.vmem [shape: f32[8,128], index: 12, kind: output, shape index: {}]  }
   0x1   :  { %18 = vsyncpa [#allocation5], 0  ;;  %s2004_s21 = smov [#allocation2]   ;;  %s1956_s25 = scalar_lea.hbm %s2609_s6, 1024 }
   0x2   :  { %s36_s22 = sshll.u32 %s2004_s21, 4  ;;  %p1957_p0 = scmp.ne.s32.totalorder %s2609_s6, %s1956_s25  ;;  %s37_s22 = int_to_ptr.vmem [resolvable:$true] %s36_s22 }
   0x3   :  { %p1960_p1 = scmp.lt.u32.totalorder %s1956_s25, %s2609_s6 }
   0x5   :  { %p1962_p2 = pnand %p1960_p1, %p1957_p0 }
   0x7   :  { %1965 = shalt.err (!%p1962_p2)
}
   0x8   :  { %s1966_s30 = scalar_lea.vmem %s37_s22, 1024  ;;  %p1971_p4 = scmp.lt.s32.totalorder %s37_s22, %s37_s22 }
   0x9   :  { %p1967_p3 = scmp.ne.s32.totalorder %s37_s22, %s1966_s30  ;;  %p1972_p5 = scmp.lt.s32.totalorder %s1966_s30, %s1966_s30 }
   0xb   :  { %p1973_p6 = por %p1972_p5, %p1971_p4 }
   0xd   :  { %p1974_p7 = pnand %p1973_p6, %p1967_p3 }
   0xf   :  { %1977 = shalt.err (!%p1974_p7)
}
  0x10   :  { %s2005_s13 = smov 64   ;;  %s2006_s14 = smov 4  }
  0x11   :  { %42 = dma.hbm_to_vmem [thread:$0]  %s2609_s6, 1024, %s37_s22, [#allocation3], %s2005_s13, %s2005_s13, %s2006_s14  }
  0x12   :  { %s2007_s17 = smov [#allocation4]   ;;  %s1978_s21 = scalar_lea.hbm %s2611_s8, 1024 }
  0x13   :  { %s50_s18 = sshll.u32 %s2007_s17, 4  ;;  %p1979_p8 = scmp.ne.s32.totalorder %s2611_s8, %s1978_s21  ;;  %s51_s18 = int_to_ptr.vmem [resolvable:$true] %s50_s18 }
  0x14   :  { %p1982_p9 = scmp.lt.u32.totalorder %s1978_s21, %s2611_s8 }
  0x16   :  { %p1984_p10 = pnand %p1982_p9, %p1979_p8 }
  0x18   :  { %1987 = shalt.err (!%p1984_p10)
}
  0x19   :  { %s1988_s27 = scalar_lea.vmem %s51_s18, 1024  ;;  %p1993_p12 = scmp.lt.s32.totalorder %s51_s18, %s51_s18 }
  0x1a   :  { %p1989_p11 = scmp.ne.s32.totalorder %s51_s18, %s1988_s27  ;;  %p1994_p13 = scmp.lt.s32.totalorder %s1988_s27, %s1988_s27 }
  0x1c   :  { %p1995_p0 = por %p1994_p13, %p1993_p12 }
  0x1e   :  { %p1996_p1 = pnand %p1995_p0, %p1989_p11 }
  0x20   :  { %1999 = shalt.err (!%p1996_p1)
}
  0x21   :  { %56 = dma.hbm_to_vmem [thread:$0]  %s2611_s8, 1024, %s51_s18, [#allocation5], %s2005_s13, %s2005_s13, %s2006_s14  }
  0x22   :  { %2000 = dma.done.wait [#allocation3], 1024  }
  0x23   :  { %2001 = vsyncadd [#allocation3], 4294966272 }
  0x24   :  { %2002 = dma.done.wait [#allocation5], 1024  }
  0x25   :  { %2003 = vsyncadd [#allocation5], 4294966272  ;;  %v2008_v0 = vmov 0.0   ;;  %vm2009_vm0 = vmmov 0   ;;  %v2109_v1 = vld [vmem:[%s2605_s2] sm:$0xff]   ;;  %v2115_v2 = vld [vmem:[%s2605_s2 + $0x8] sm:$0xff]  }
  0x26   :  { %1466 = vmatprep.subr.bf16.mxu0 %v2008_v0  ;;  %1482 = vmatprep.mubr.msk.bf16.mxu0 %vm2009_vm0, %v2008_v0  ;;  %v2122_v3 = vld [vmem:[%s2605_s2 + $0x10] sm:$0xff]   ;;  %v2128_v4 = vld [vmem:[%s2607_s4] sm:$0xff]   ;;  %v2134_v5 = vld [vmem:[%s2605_s2 + $0x18] sm:$0xff]  }
  0x27   :  { %1486 = vmatprep.subr.bf16.mxu1 %v2008_v0  ;;  %1502 = vmatprep.mubr.msk.bf16.mxu1 %vm2009_vm0, %v2008_v0  ;;  %v2141_v6 = vld [vmem:[%s2607_s4 + $0x8] sm:$0xff]   ;;  %v2146_v7 = vld [vmem:[%s2605_s2 + $0x20] sm:$0xff]   ;;  %v2152_v8 = vld [vmem:[%s2607_s4 + $0x10] sm:$0xff]  }
  0x28   :  { %1467 = vmatpush3.bf16.msra.mxu0 %v2109_v1  ;;  %1487 = vmatpush3.bf16.msra.mxu1 %v2128_v4  ;;  %v2160_v9 = vld [vmem:[%s2605_s2 + $0x28] sm:$0xff]   ;;  %v2166_v10 = vld [vmem:[%s2607_s4 + $0x18] sm:$0xff]   ;;  %v2174_v11 = vld [vmem:[%s2605_s2 + $0x30] sm:$0xff]  }
  0x29   :  { %1468 = vmatprep.subr.bf16.mxu0 %v2008_v0  ;;  %1488 = vmatprep.subr.bf16.mxu1 %v2008_v0  ;;  %v2185_v12 = vld [vmem:[%s2605_s2 + $0x38] sm:$0xff]   ;;  %v84_v13 = vld [vmem:[%s2603_s0] sm:$0xff]  ;;  %v2221_v16 = vld [vmem:[%s2607_s4 + $0x28] sm:$0xff]  }
  0x2a   :  { %v86_v14 = vpack.c.bf16 %v84_v13, %v84_v13  ;;  %v2214_v15 = vld [vmem:[%s2607_s4 + $0x20] sm:$0xff]   ;;  %v2227_v17 = vld [vmem:[%s2607_s4 + $0x30] sm:$0xff]   ;;  %v2234_v18 = vld [vmem:[%s2607_s4 + $0x38] sm:$0xff]  }
  0x2b   :  { %v2242_v19 = vld [vmem:[%s2606_s3] ss:$0 sm:$0xff]  ;;  %v1261_v25 = vld [vmem:[%s2603_s0 + $0x8] sm:$0xff]  ;;  %v1262_v41 = vld [vmem:[%s2603_s0 + $0x10] sm:$0xff] }
  0x2c   :  { %1469 = vmatpush3.bf16.msra.mxu0 %v2115_v2  ;;  %1489 = vmatpush3.bf16.msra.mxu1 %v2141_v6  ;;  %v2287_v30 = vld [vmem:[%s2608_s5] ss:$0 sm:$0xff]  ;;  %v1263_v58 = vld [vmem:[%s2603_s0 + $0x18] sm:$0xff] }
  0x2d   :  { %1470 = vmatprep.subr.bf16.mxu0 %v2008_v0  ;;  %1490 = vmatprep.subr.bf16.mxu1 %v2008_v0 }
  0x30   :  { %1471 = vmatpush3.bf16.msra.mxu0 %v2122_v3  ;;  %1491 = vmatpush3.bf16.msra.mxu1 %v2152_v8 }
  0x31   :  { %1472 = vmatprep.subr.bf16.mxu0 %v2008_v0  ;;  %1492 = vmatprep.subr.bf16.mxu1 %v2008_v0 }
  0x34   :  { %1473 = vmatpush3.bf16.msra.mxu0 %v2134_v5  ;;  %1493 = vmatpush3.bf16.msra.mxu1 %v2166_v10 }
  0x35   :  { %1474 = vmatprep.subr.bf16.mxu0 %v2008_v0  ;;  %1494 = vmatprep.subr.bf16.mxu1 %v2008_v0 }
  0x38   :  { %1475 = vmatpush3.bf16.msra.mxu0 %v2146_v7  ;;  %1495 = vmatpush3.bf16.msra.mxu1 %v2214_v15 }
  0x39   :  { %1476 = vmatprep.subr.bf16.mxu0 %v2008_v0  ;;  %1496 = vmatprep.subr.bf16.mxu1 %v2008_v0 }
  0x3c   :  { %1477 = vmatpush3.bf16.msra.mxu0 %v2160_v9  ;;  %1497 = vmatpush3.bf16.msra.mxu1 %v2221_v16 }
  0x3d   :  { %1478 = vmatprep.subr.bf16.mxu0 %v2008_v0  ;;  %1498 = vmatprep.subr.bf16.mxu1 %v2008_v0 }
  0x40   :  { %1479 = vmatpush3.bf16.msra.mxu0 %v2174_v11  ;;  %1499 = vmatpush3.bf16.msra.mxu1 %v2227_v17 }
  0x41   :  { %1480 = vmatprep.subr.bf16.mxu0 %v2008_v0  ;;  %1500 = vmatprep.subr.bf16.mxu1 %v2008_v0 }
  0x44   :  { %1481 = vmatpush3.bf16.msra.mxu0 %v2185_v12  ;;  %1501 = vmatpush3.bf16.msra.mxu1 %v2234_v18 }
  0x45   :  { %1506 = vmatprep.subr.bf16.mxu0 %v2008_v0  ;;  %1526 = vmatprep.subr.bf16.mxu1 %v2008_v0 }
  0x47   :  { %1483 = vmatmul.mubr.bf16.vlgmr.msra.gmra.mrb[0].mxu0 %v86_v14 }
  0x48   :  { %1507 = vmatpush3.bf16.msra.mxu0 %v2109_v1  ;;  %1522 = vmatprep.mubr.msk.bf16.mxu0 %vm2009_vm0, %v2008_v0 }
  0x49   :  { %1508 = vmatprep.subr.bf16.mxu0 %v2008_v0 }
  0x4c   :  { %1509 = vmatpush3.bf16.msra.mxu0 %v2115_v2 }
  0x4d   :  { %1510 = vmatprep.subr.bf16.mxu0 %v2008_v0 }
  0x50   :  { %1511 = vmatpush3.bf16.msra.mxu0 %v2122_v3 }
  0x51   :  { %1512 = vmatprep.subr.bf16.mxu0 %v2008_v0 }
  0x54   :  { %1513 = vmatpush3.bf16.msra.mxu0 %v2134_v5 }
  0x55   :  { %1514 = vmatprep.subr.bf16.mxu0 %v2008_v0 }
  0x58   :  { %1515 = vmatpush3.bf16.msra.mxu0 %v2146_v7 }
  0x59   :  { %1516 = vmatprep.subr.bf16.mxu0 %v2008_v0 }
  0x5c   :  { %1517 = vmatpush3.bf16.msra.mxu0 %v2160_v9 }
  0x5d   :  { %1518 = vmatprep.subr.bf16.mxu0 %v2008_v0 }
  0x60   :  { %1519 = vmatpush3.bf16.msra.mxu0 %v2174_v11 }
  0x61   :  { %1520 = vmatprep.subr.bf16.mxu0 %v2008_v0 }
  0x64   :  { %1521 = vmatpush3.bf16.msra.mxu0 %v2185_v12 }
  0x65   :  { %1546 = vmatprep.subr.bf16.mxu0 %v2008_v0 }
 0x11a   :  { %v185_v20 = vpop.f32.mrb[0].mxu0 }
 0x11b   :  { %v186_v21 = vadd.f32 %v2242_v19, %v185_v20  ;;  %v1484_v22 = vpop.f32.mrb[1].mxu0 }
 0x11c   :  { %v188_v23 = vpop.f32.mrb[2].mxu0 }
 0x11d   :  { %1924 = vtanh.f32 %v186_v21  ;;  %v1485_v24 = vpop.f32.mrb[3].mxu0 }
 0x127   :  { %v1925_v26 = vpop.eup %1924 }
 0x128   :  { %v193_v27 = vpack.c.bf16 %v1925_v26, %v1925_v26  ;;  %v301_v28 = vadd.f32 %v1925_v26, %v1261_v25 }
 0x12a   :  { %1503 = vmatmul.mubr.bf16.vlgmr.msra.gmra.mrb[0].mxu1 %v193_v27  ;;  %v302_v29 = vpack.c.bf16 %v301_v28, %v301_v28 }
 0x12b   :  { %1527 = vmatpush3.bf16.msra.mxu1 %v2128_v4  ;;  %1542 = vmatprep.mubr.msk.bf16.mxu1 %vm2009_vm0, %v2008_v0 }
 0x12c   :  { %1523 = vmatmul.mubr.bf16.vlgmr.msra.gmra.mrb[4].mxu0 %v302_v29  ;;  %1528 = vmatprep.subr.bf16.mxu1 %v2008_v0  ;;  %v1264_v29 = vld [vmem:[%s2603_s0 + $0x20] sm:$0xff] }
 0x12d   :  { %1547 = vmatpush3.bf16.msra.mxu0 %v2109_v1  ;;  %1562 = vmatprep.mubr.msk.bf16.mxu0 %vm2009_vm0, %v2008_v0 }
 0x12e   :  { %1548 = vmatprep.subr.bf16.mxu0 %v2008_v0 }
 0x12f   :  { %1529 = vmatpush3.bf16.msra.mxu1 %v2141_v6 }
 0x130   :  { %1530 = vmatprep.subr.bf16.mxu1 %v2008_v0 }
 0x131   :  { %1549 = vmatpush3.bf16.msra.mxu0 %v2115_v2 }
 0x132   :  { %1550 = vmatprep.subr.bf16.mxu0 %v2008_v0 }
 0x133   :  { %1531 = vmatpush3.bf16.msra.mxu1 %v2152_v8 }
 0x134   :  { %1532 = vmatprep.subr.bf16.mxu1 %v2008_v0 }
 0x135   :  { %1551 = vmatpush3.bf16.msra.mxu0 %v2122_v3 }
 0x136   :  { %1552 = vmatprep.subr.bf16.mxu0 %v2008_v0 }
 0x137   :  { %1533 = vmatpush3.bf16.msra.mxu1 %v2166_v10 }
 0x138   :  { %1534 = vmatprep.subr.bf16.mxu1 %v2008_v0 }
 0x139   :  { %1553 = vmatpush3.bf16.msra.mxu0 %v2134_v5 }
 0x13a   :  { %1554 = vmatprep.subr.bf16.mxu0 %v2008_v0 }
 0x13b   :  { %1535 = vmatpush3.bf16.msra.mxu1 %v2214_v15 }
 0x13c   :  { %1536 = vmatprep.subr.bf16.mxu1 %v2008_v0 }
 0x13d   :  { %1555 = vmatpush3.bf16.msra.mxu0 %v2146_v7 }
 0x13e   :  { %1556 = vmatprep.subr.bf16.mxu0 %v2008_v0 }
 0x13f   :  { %1537 = vmatpush3.bf16.msra.mxu1 %v2221_v16 }
 0x140   :  { %1538 = vmatprep.subr.bf16.mxu1 %v2008_v0 }
 0x141   :  { %1557 = vmatpush3.bf16.msra.mxu0 %v2160_v9 }
 0x142   :  { %1558 = vmatprep.subr.bf16.mxu0 %v2008_v0 }
 0x143   :  { %1539 = vmatpush3.bf16.msra.mxu1 %v2227_v17 }
 0x144   :  { %1540 = vmatprep.subr.bf16.mxu1 %v2008_v0 }
 0x145   :  { %1559 = vmatpush3.bf16.msra.mxu0 %v2174_v11 }
 0x146   :  { %1560 = vmatprep.subr.bf16.mxu0 %v2008_v0 }
 0x147   :  { %1541 = vmatpush3.bf16.msra.mxu1 %v2234_v18 }
 0x148   :  { %1566 = vmatprep.subr.bf16.mxu1 %v2008_v0 }
 0x149   :  { %1561 = vmatpush3.bf16.msra.mxu0 %v2185_v12 }
 0x14a   :  { %1586 = vmatprep.subr.bf16.mxu0 %v2008_v0 }
 0x1fd   :  { %v292_v31 = vpop.f32.mrb[0].mxu1 }
 0x1fe   :  { %v293_v32 = vadd.f32 %v2287_v30, %v292_v31  ;;  %v1504_v33 = vpop.f32.mrb[1].mxu1 }
 0x1ff   :  { %v295_v34 = vpop.f32.mrb[2].mxu1  ;;  %v337_v35 = vpop.f32.mrb[4].mxu0 }
 0x200   :  { %v338_v36 = vadd.f32 %v2242_v19, %v337_v35  ;;  %v1505_v37 = vpop.f32.mrb[3].mxu1  ;;  %v1524_v38 = vpop.f32.mrb[5].mxu0  ;;  %1926 = vtanh.f32 %v293_v32 }
 0x201   :  { %v340_v39 = vpop.f32.mrb[6].mxu0 }
 0x202   :  { %1928 = vtanh.f32 %v338_v36  ;;  %v1525_v40 = vpop.f32.mrb[7].mxu0 }
 0x20a   :  { %v1927_v42 = vpop.eup %1926 }
 0x20c   :  { %v1929_v43 = vpop.eup %1928 }
 0x20d   :  { %v344_v44 = vadd.f32 %v1929_v43, %v1927_v42  ;;  %v389_v45 = vadd.f32 %v1929_v43, %v1262_v41 }
 0x20f   :  { %v345_v46 = vpack.c.bf16 %v344_v44, %v344_v44  ;;  %v390_v47 = vpack.c.bf16 %v389_v45, %v389_v45 }
 0x211   :  { %1543 = vmatmul.mubr.bf16.vlgmr.msra.gmra.mrb[4].mxu1 %v345_v46  ;;  %1563 = vmatmul.mubr.bf16.vlgmr.msra.gmra.mrb[8].mxu0 %v390_v47  ;;  %v1265_v47 = vld [vmem:[%s2603_s0 + $0x28] sm:$0xff] }
 0x212   :  { %1567 = vmatpush3.bf16.msra.mxu1 %v2128_v4  ;;  %1587 = vmatpush3.bf16.msra.mxu0 %v2109_v1 }
 0x213   :  { %1568 = vmatprep.subr.bf16.mxu1 %v2008_v0  ;;  %1588 = vmatprep.subr.bf16.mxu0 %v2008_v0 }
 0x214   :  { %1582 = vmatprep.mubr.msk.bf16.mxu1 %vm2009_vm0, %v2008_v0  ;;  %1602 = vmatprep.mubr.msk.bf16.mxu0 %vm2009_vm0, %v2008_v0 }
 0x216   :  { %1569 = vmatpush3.bf16.msra.mxu1 %v2141_v6  ;;  %1589 = vmatpush3.bf16.msra.mxu0 %v2115_v2 }
 0x217   :  { %1570 = vmatprep.subr.bf16.mxu1 %v2008_v0  ;;  %1590 = vmatprep.subr.bf16.mxu0 %v2008_v0 }
 0x21a   :  { %1571 = vmatpush3.bf16.msra.mxu1 %v2152_v8  ;;  %1591 = vmatpush3.bf16.msra.mxu0 %v2122_v3 }
 0x21b   :  { %1572 = vmatprep.subr.bf16.mxu1 %v2008_v0  ;;  %1592 = vmatprep.subr.bf16.mxu0 %v2008_v0 }
 0x21e   :  { %1573 = vmatpush3.bf16.msra.mxu1 %v2166_v10  ;;  %1593 = vmatpush3.bf16.msra.mxu0 %v2134_v5 }
 0x21f   :  { %1574 = vmatprep.subr.bf16.mxu1 %v2008_v0  ;;  %1594 = vmatprep.subr.bf16.mxu0 %v2008_v0 }
 0x222   :  { %1575 = vmatpush3.bf16.msra.mxu1 %v2214_v15  ;;  %1595 = vmatpush3.bf16.msra.mxu0 %v2146_v7 }
 0x223   :  { %1576 = vmatprep.subr.bf16.mxu1 %v2008_v0  ;;  %1596 = vmatprep.subr.bf16.mxu0 %v2008_v0 }
 0x226   :  { %1577 = vmatpush3.bf16.msra.mxu1 %v2221_v16  ;;  %1597 = vmatpush3.bf16.msra.mxu0 %v2160_v9 }
 0x227   :  { %1578 = vmatprep.subr.bf16.mxu1 %v2008_v0  ;;  %1598 = vmatprep.subr.bf16.mxu0 %v2008_v0 }
 0x22a   :  { %1579 = vmatpush3.bf16.msra.mxu1 %v2227_v17  ;;  %1599 = vmatpush3.bf16.msra.mxu0 %v2174_v11 }
 0x22b   :  { %1580 = vmatprep.subr.bf16.mxu1 %v2008_v0  ;;  %1600 = vmatprep.subr.bf16.mxu0 %v2008_v0 }
 0x22e   :  { %1581 = vmatpush3.bf16.msra.mxu1 %v2234_v18  ;;  %1601 = vmatpush3.bf16.msra.mxu0 %v2185_v12 }
 0x22f   :  { %1606 = vmatprep.subr.bf16.mxu1 %v2008_v0  ;;  %1626 = vmatprep.subr.bf16.mxu0 %v2008_v0 }
 0x2e4   :  { %v380_v48 = vpop.f32.mrb[4].mxu1  ;;  %v425_v49 = vpop.f32.mrb[8].mxu0 }
 0x2e5   :  { %v381_v50 = vadd.f32 %v2287_v30, %v380_v48  ;;  %v426_v51 = vadd.f32 %v2242_v19, %v425_v49  ;;  %v1544_v52 = vpop.f32.mrb[5].mxu1  ;;  %v1564_v53 = vpop.f32.mrb[9].mxu0 }
 0x2e6   :  { %v383_v54 = vpop.f32.mrb[6].mxu1  ;;  %v428_v55 = vpop.f32.mrb[10].mxu0 }
 0x2e7   :  { %1930 = vtanh.f32 %v381_v50  ;;  %v1545_v56 = vpop.f32.mrb[7].mxu1  ;;  %v1565_v57 = vpop.f32.mrb[11].mxu0 }
 0x2e8   :  { %1932 = vtanh.f32 %v426_v51 }
 0x2f1   :  { %v1931_v59 = vpop.eup %1930 }
 0x2f2   :  { %v1933_v60 = vpop.eup %1932 }
 0x2f3   :  { %v432_v61 = vadd.f32 %v1933_v60, %v1931_v59  ;;  %v477_v62 = vadd.f32 %v1933_v60, %v1263_v58 }
 0x2f5   :  { %v433_v63 = vpack.c.bf16 %v432_v61, %v432_v61  ;;  %v478_v13 = vpack.c.bf16 %v477_v62, %v477_v62 }
 0x2f7   :  { %1583 = vmatmul.mubr.bf16.vlgmr.msra.gmra.mrb[8].mxu1 %v433_v63  ;;  %1603 = vmatmul.mubr.bf16.vlgmr.msra.gmra.mrb[12].mxu0 %v478_v13  ;;  %v1266_v13 = vld [vmem:[%s2603_s0 + $0x30] sm:$0xff] }
 0x2f8   :  { %1607 = vmatpush3.bf16.msra.mxu1 %v2128_v4  ;;  %1627 = vmatpush3.bf16.msra.mxu0 %v2109_v1 }
 0x2f9   :  { %1608 = vmatprep.subr.bf16.mxu1 %v2008_v0  ;;  %1628 = vmatprep.subr.bf16.mxu0 %v2008_v0 }
 0x2fa   :  { %1622 = vmatprep.mubr.msk.bf16.mxu1 %vm2009_vm0, %v2008_v0  ;;  %1642 = vmatprep.mubr.msk.bf16.mxu0 %vm2009_vm0, %v2008_v0 }
 0x2fc   :  { %1609 = vmatpush3.bf16.msra.mxu1 %v2141_v6  ;;  %1629 = vmatpush3.bf16.msra.mxu0 %v2115_v2 }
 0x2fd   :  { %1610 = vmatprep.subr.bf16.mxu1 %v2008_v0  ;;  %1630 = vmatprep.subr.bf16.mxu0 %v2008_v0 }
 0x300   :  { %1611 = vmatpush3.bf16.msra.mxu1 %v2152_v8  ;;  %1631 = vmatpush3.bf16.msra.mxu0 %v2122_v3 }
 0x301   :  { %1612 = vmatprep.subr.bf16.mxu1 %v2008_v0  ;;  %1632 = vmatprep.subr.bf16.mxu0 %v2008_v0 }
 0x304   :  { %1613 = vmatpush3.bf16.msra.mxu1 %v2166_v10  ;;  %1633 = vmatpush3.bf16.msra.mxu0 %v2134_v5 }
 0x305   :  { %1614 = vmatprep.subr.bf16.mxu1 %v2008_v0  ;;  %1634 = vmatprep.subr.bf16.mxu0 %v2008_v0 }
 0x308   :  { %1615 = vmatpush3.bf16.msra.mxu1 %v2214_v15  ;;  %1635 = vmatpush3.bf16.msra.mxu0 %v2146_v7 }
 0x309   :  { %1616 = vmatprep.subr.bf16.mxu1 %v2008_v0  ;;  %1636 = vmatprep.subr.bf16.mxu0 %v2008_v0 }
 0x30c   :  { %1617 = vmatpush3.bf16.msra.mxu1 %v2221_v16  ;;  %1637 = vmatpush3.bf16.msra.mxu0 %v2160_v9 }
 0x30d   :  { %1618 = vmatprep.subr.bf16.mxu1 %v2008_v0  ;;  %1638 = vmatprep.subr.bf16.mxu0 %v2008_v0 }
 0x310   :  { %1619 = vmatpush3.bf16.msra.mxu1 %v2227_v17  ;;  %1639 = vmatpush3.bf16.msra.mxu0 %v2174_v11 }
 0x311   :  { %1620 = vmatprep.subr.bf16.mxu1 %v2008_v0  ;;  %1640 = vmatprep.subr.bf16.mxu0 %v2008_v0 }
 0x314   :  { %1621 = vmatpush3.bf16.msra.mxu1 %v2234_v18  ;;  %1641 = vmatpush3.bf16.msra.mxu0 %v2185_v12 }
 0x315   :  { %1646 = vmatprep.subr.bf16.mxu1 %v2008_v0  ;;  %1666 = vmatprep.subr.bf16.mxu0 %v2008_v0 }
 0x3ca   :  { %v468_v14 = vpop.f32.mrb[8].mxu1  ;;  %v513_v20 = vpop.f32.mrb[12].mxu0 }
 0x3cb   :  { %v469_v21 = vadd.f32 %v2287_v30, %v468_v14  ;;  %v514_v22 = vadd.f32 %v2242_v19, %v513_v20  ;;  %v1584_v23 = vpop.f32.mrb[9].mxu1  ;;  %v1604_v24 = vpop.f32.mrb[13].mxu0 }
 0x3cc   :  { %v471_v25 = vpop.f32.mrb[10].mxu1  ;;  %v516_v26 = vpop.f32.mrb[14].mxu0 }
 0x3cd   :  { %1934 = vtanh.f32 %v469_v21  ;;  %v1585_v27 = vpop.f32.mrb[11].mxu1  ;;  %v1605_v28 = vpop.f32.mrb[15].mxu0 }
 0x3ce   :  { %1936 = vtanh.f32 %v514_v22 }
 0x3d7   :  { %v1935_v31 = vpop.eup %1934 }
 0x3d8   :  { %v1937_v32 = vpop.eup %1936 }
 0x3d9   :  { %v520_v33 = vadd.f32 %v1937_v32, %v1935_v31  ;;  %v565_v34 = vadd.f32 %v1937_v32, %v1264_v29 }
 0x3db   :  { %v521_v35 = vpack.c.bf16 %v520_v33, %v520_v33  ;;  %v566_v36 = vpack.c.bf16 %v565_v34, %v565_v34 }
 0x3dd   :  { %1623 = vmatmul.mubr.bf16.vlgmr.msra.gmra.mrb[12].mxu1 %v521_v35  ;;  %1643 = vmatmul.mubr.bf16.vlgmr.msra.gmra.mrb[16].mxu0 %v566_v36 }
 0x3de   :  { %1647 = vmatpush3.bf16.msra.mxu1 %v2128_v4  ;;  %1667 = vmatpush3.bf16.msra.mxu0 %v2109_v1 }
 0x3df   :  { %1648 = vmatprep.subr.bf16.mxu1 %v2008_v0  ;;  %1668 = vmatprep.subr.bf16.mxu0 %v2008_v0 }
 0x3e0   :  { %1662 = vmatprep.mubr.msk.bf16.mxu1 %vm2009_vm0, %v2008_v0  ;;  %1682 = vmatprep.mubr.msk.bf16.mxu0 %vm2009_vm0, %v2008_v0 }
 0x3e2   :  { %1649 = vmatpush3.bf16.msra.mxu1 %v2141_v6  ;;  %1669 = vmatpush3.bf16.msra.mxu0 %v2115_v2 }
 0x3e3   :  { %1650 = vmatprep.subr.bf16.mxu1 %v2008_v0  ;;  %1670 = vmatprep.subr.bf16.mxu0 %v2008_v0 }
 0x3e6   :  { %1651 = vmatpush3.bf16.msra.mxu1 %v2152_v8  ;;  %1671 = vmatpush3.bf16.msra.mxu0 %v2122_v3 }
 0x3e7   :  { %1652 = vmatprep.subr.bf16.mxu1 %v2008_v0  ;;  %1672 = vmatprep.subr.bf16.mxu0 %v2008_v0 }
 0x3ea   :  { %1653 = vmatpush3.bf16.msra.mxu1 %v2166_v10  ;;  %1673 = vmatpush3.bf16.msra.mxu0 %v2134_v5 }
 0x3eb   :  { %1654 = vmatprep.subr.bf16.mxu1 %v2008_v0  ;;  %1674 = vmatprep.subr.bf16.mxu0 %v2008_v0 }
 0x3ee   :  { %1655 = vmatpush3.bf16.msra.mxu1 %v2214_v15  ;;  %1675 = vmatpush3.bf16.msra.mxu0 %v2146_v7 }
 0x3ef   :  { %1656 = vmatprep.subr.bf16.mxu1 %v2008_v0  ;;  %1676 = vmatprep.subr.bf16.mxu0 %v2008_v0 }
 0x3f2   :  { %1657 = vmatpush3.bf16.msra.mxu1 %v2221_v16  ;;  %1677 = vmatpush3.bf16.msra.mxu0 %v2160_v9 }
 0x3f3   :  { %1658 = vmatprep.subr.bf16.mxu1 %v2008_v0  ;;  %1678 = vmatprep.subr.bf16.mxu0 %v2008_v0 }
 0x3f6   :  { %1659 = vmatpush3.bf16.msra.mxu1 %v2227_v17  ;;  %1679 = vmatpush3.bf16.msra.mxu0 %v2174_v11 }
 0x3f7   :  { %1660 = vmatprep.subr.bf16.mxu1 %v2008_v0  ;;  %1680 = vmatprep.subr.bf16.mxu0 %v2008_v0 }
 0x3fa   :  { %1661 = vmatpush3.bf16.msra.mxu1 %v2234_v18  ;;  %1681 = vmatpush3.bf16.msra.mxu0 %v2185_v12 }
 0x3fb   :  { %1686 = vmatprep.subr.bf16.mxu1 %v2008_v0  ;;  %1706 = vmatprep.subr.bf16.mxu0 %v2008_v0 }
 0x4b0   :  { %v556_v37 = vpop.f32.mrb[12].mxu1  ;;  %v601_v38 = vpop.f32.mrb[16].mxu0 }
 0x4b1   :  { %v557_v39 = vadd.f32 %v2287_v30, %v556_v37  ;;  %v602_v40 = vadd.f32 %v2242_v19, %v601_v38  ;;  %v1624_v41 = vpop.f32.mrb[13].mxu1  ;;  %v1644_v42 = vpop.f32.mrb[17].mxu0 }
 0x4b2   :  { %v559_v43 = vpop.f32.mrb[14].mxu1  ;;  %v604_v44 = vpop.f32.mrb[18].mxu0 }
 0x4b3   :  { %1938 = vtanh.f32 %v557_v39  ;;  %v1625_v45 = vpop.f32.mrb[15].mxu1  ;;  %v1645_v46 = vpop.f32.mrb[19].mxu0 }
 0x4b4   :  { %1940 = vtanh.f32 %v602_v40  ;;  %v1912_v45 = vld [vmem:[#allocation2 + $0x20] sm:$0xff]   ;;  %v1913_v46 = vld [vmem:[#allocation2 + $0x28] sm:$0xff]  }
 0x4bd   :  { %v1939_v48 = vpop.eup %1938 }
 0x4be   :  { %v1941_v49 = vpop.eup %1940 }
 0x4bf   :  { %v608_v50 = vadd.f32 %v1941_v49, %v1939_v48  ;;  %v653_v51 = vadd.f32 %v1941_v49, %v1265_v47  ;;  %v1915_v47 = vld [vmem:[#allocation2 + $0x38] sm:$0xff]   ;;  %v1916_v48 = vld [vmem:[#allocation4] sm:$0xff]   ;;  %v1917_v49 = vld [vmem:[#allocation4 + $0x8] sm:$0xff]  }
 0x4c1   :  { %v609_v52 = vpack.c.bf16 %v608_v50, %v608_v50  ;;  %v654_v53 = vpack.c.bf16 %v653_v51, %v653_v51  ;;  %v1918_v50 = vld [vmem:[#allocation4 + $0x10] sm:$0xff]   ;;  %v1919_v51 = vld [vmem:[#allocation4 + $0x18] sm:$0xff]  }
 0x4c3   :  { %1663 = vmatmul.mubr.bf16.vlgmr.msra.gmra.mrb[16].mxu1 %v609_v52  ;;  %1683 = vmatmul.mubr.bf16.vlgmr.msra.gmra.mrb[20].mxu0 %v654_v53  ;;  %v1920_v52 = vld [vmem:[#allocation4 + $0x20] sm:$0xff]   ;;  %v1921_v53 = vld [vmem:[#allocation4 + $0x28] sm:$0xff]  }
 0x4c4   :  { %1687 = vmatpush3.bf16.msra.mxu1 %v2128_v4  ;;  %1707 = vmatpush3.bf16.msra.mxu0 %v2109_v1 }
 0x4c5   :  { %1688 = vmatprep.subr.bf16.mxu1 %v2008_v0  ;;  %1708 = vmatprep.subr.bf16.mxu0 %v2008_v0 }
 0x4c6   :  { %1702 = vmatprep.mubr.msk.bf16.mxu1 %vm2009_vm0, %v2008_v0  ;;  %1722 = vmatprep.mubr.msk.bf16.mxu0 %vm2009_vm0, %v2008_v0 }
 0x4c8   :  { %1689 = vmatpush3.bf16.msra.mxu1 %v2141_v6  ;;  %1709 = vmatpush3.bf16.msra.mxu0 %v2115_v2 }
 0x4c9   :  { %1690 = vmatprep.subr.bf16.mxu1 %v2008_v0  ;;  %1710 = vmatprep.subr.bf16.mxu0 %v2008_v0 }
 0x4cc   :  { %1691 = vmatpush3.bf16.msra.mxu1 %v2152_v8  ;;  %1711 = vmatpush3.bf16.msra.mxu0 %v2122_v3 }
 0x4cd   :  { %1692 = vmatprep.subr.bf16.mxu1 %v2008_v0  ;;  %1712 = vmatprep.subr.bf16.mxu0 %v2008_v0 }
 0x4d0   :  { %1693 = vmatpush3.bf16.msra.mxu1 %v2166_v10  ;;  %1713 = vmatpush3.bf16.msra.mxu0 %v2134_v5 }
 0x4d1   :  { %1694 = vmatprep.subr.bf16.mxu1 %v2008_v0  ;;  %1714 = vmatprep.subr.bf16.mxu0 %v2008_v0 }
 0x4d4   :  { %1695 = vmatpush3.bf16.msra.mxu1 %v2214_v15  ;;  %1715 = vmatpush3.bf16.msra.mxu0 %v2146_v7 }
 0x4d5   :  { %1696 = vmatprep.subr.bf16.mxu1 %v2008_v0  ;;  %1716 = vmatprep.subr.bf16.mxu0 %v2008_v0 }
 0x4d8   :  { %1697 = vmatpush3.bf16.msra.mxu1 %v2221_v16  ;;  %1717 = vmatpush3.bf16.msra.mxu0 %v2160_v9 }
 0x4d9   :  { %1698 = vmatprep.subr.bf16.mxu1 %v2008_v0  ;;  %1718 = vmatprep.subr.bf16.mxu0 %v2008_v0 }
 0x4dc   :  { %1699 = vmatpush3.bf16.msra.mxu1 %v2227_v17  ;;  %1719 = vmatpush3.bf16.msra.mxu0 %v2174_v11 }
 0x4dd   :  { %1700 = vmatprep.subr.bf16.mxu1 %v2008_v0  ;;  %1720 = vmatprep.subr.bf16.mxu0 %v2008_v0 }
 0x4e0   :  { %1701 = vmatpush3.bf16.msra.mxu1 %v2234_v18  ;;  %1721 = vmatpush3.bf16.msra.mxu0 %v2185_v12 }
 0x4e1   :  { %1726 = vmatprep.subr.bf16.mxu1 %v2008_v0  ;;  %1746 = vmatprep.subr.bf16.mxu0 %v2008_v0 }
 0x596   :  { %v644_v54 = vpop.f32.mrb[16].mxu1  ;;  %v689_v55 = vpop.f32.mrb[20].mxu0 }
 0x597   :  { %v645_v56 = vadd.f32 %v2287_v30, %v644_v54  ;;  %v690_v57 = vadd.f32 %v2242_v19, %v689_v55  ;;  %v1664_v58 = vpop.f32.mrb[17].mxu1  ;;  %v1684_v59 = vpop.f32.mrb[21].mxu0 }
 0x598   :  { %v647_v60 = vpop.f32.mrb[18].mxu1  ;;  %v692_v61 = vpop.f32.mrb[22].mxu0  ;;  %v915_v59 = vld [vmem:[%s2604_s1] sm:$0xff] }
 0x599   :  { %1942 = vtanh.f32 %v645_v56  ;;  %v1665_v62 = vpop.f32.mrb[19].mxu1  ;;  %v1685_v63 = vpop.f32.mrb[23].mxu0 }
 0x59a   :  { %1944 = vtanh.f32 %v690_v57  ;;  %v1922_v63 = vld [vmem:[#allocation4 + $0x30] sm:$0xff]  }
 0x5a3   :  { %v1943_v14 = vpop.eup %1942 }
 0x5a4   :  { %v1945_v20 = vpop.eup %1944 }
 0x5a5   :  { %v696_v21 = vadd.f32 %v1945_v20, %v1943_v14  ;;  %v741_v22 = vadd.f32 %v1945_v20, %v1266_v13  ;;  %v1143_v13 = vld [vmem:[%s2613_s10] sm:$0xff]  ;;  %v1144_v14 = vld [vmem:[%s2613_s10 + $0x8] sm:$0xff]  ;;  %v1145_v20 = vld [vmem:[%s2613_s10 + $0x10] sm:$0xff] }
 0x5a7   :  { %v697_v23 = vpack.c.bf16 %v696_v21, %v696_v21  ;;  %v742_v24 = vpack.c.bf16 %v741_v22, %v741_v22  ;;  %v2010_v21 = vmov 0.0|0.0   ;;  %v1862_v22 = vpack.c.bf16 %v1144_v14, %v1143_v13 }
 0x5a9   :  { %1703 = vmatmul.mubr.bf16.vlgmr.msra.gmra.mrb[20].mxu1 %v697_v23  ;;  %1723 = vmatmul.mubr.bf16.vlgmr.msra.gmra.mrb[24].mxu0 %v742_v24  ;;  %v1147_v24 = vld [vmem:[%s2613_s10 + $0x20] sm:$0xff] }
 0x5aa   :  { %1727 = vmatpush3.bf16.msra.mxu1 %v2128_v4  ;;  %1747 = vmatpush3.bf16.msra.mxu0 %v2109_v1 }
 0x5ab   :  { %1728 = vmatprep.subr.bf16.mxu1 %v2008_v0  ;;  %1748 = vmatprep.subr.bf16.mxu0 %v2008_v0 }
 0x5ac   :  { %1742 = vmatprep.mubr.msk.bf16.mxu1 %vm2009_vm0, %v2008_v0  ;;  %1762 = vmatprep.mubr.msk.bf16.mxu0 %vm2009_vm0, %v2008_v0 }
 0x5ae   :  { %1729 = vmatpush3.bf16.msra.mxu1 %v2141_v6  ;;  %1749 = vmatpush3.bf16.msra.mxu0 %v2115_v2 }
 0x5af   :  { %1730 = vmatprep.subr.bf16.mxu1 %v2008_v0  ;;  %1750 = vmatprep.subr.bf16.mxu0 %v2008_v0 }
 0x5b2   :  { %1731 = vmatpush3.bf16.msra.mxu1 %v2152_v8  ;;  %1751 = vmatpush3.bf16.msra.mxu0 %v2122_v3 }
 0x5b3   :  { %1732 = vmatprep.subr.bf16.mxu1 %v2008_v0  ;;  %1752 = vmatprep.subr.bf16.mxu0 %v2008_v0 }
 0x5b6   :  { %1733 = vmatpush3.bf16.msra.mxu1 %v2166_v10  ;;  %1753 = vmatpush3.bf16.msra.mxu0 %v2134_v5 }
 0x5b7   :  { %1734 = vmatprep.subr.bf16.mxu1 %v2008_v0  ;;  %1754 = vmatprep.subr.bf16.mxu0 %v2008_v0 }
 0x5ba   :  { %1735 = vmatpush3.bf16.msra.mxu1 %v2214_v15  ;;  %1755 = vmatpush3.bf16.msra.mxu0 %v2146_v7 }
 0x5bb   :  { %1736 = vmatprep.subr.bf16.mxu1 %v2008_v0  ;;  %1756 = vmatprep.subr.bf16.mxu0 %v2008_v0 }
 0x5be   :  { %1737 = vmatpush3.bf16.msra.mxu1 %v2221_v16  ;;  %1757 = vmatpush3.bf16.msra.mxu0 %v2160_v9 }
 0x5bf   :  { %1738 = vmatprep.subr.bf16.mxu1 %v2008_v0  ;;  %1758 = vmatprep.subr.bf16.mxu0 %v2008_v0 }
 0x5c2   :  { %1739 = vmatpush3.bf16.msra.mxu1 %v2227_v17  ;;  %1759 = vmatpush3.bf16.msra.mxu0 %v2174_v11 }
 0x5c3   :  { %1740 = vmatprep.subr.bf16.mxu1 %v2008_v0  ;;  %1760 = vmatprep.subr.bf16.mxu0 %v2008_v0 }
 0x5c6   :  { %1741 = vmatpush3.bf16.msra.mxu1 %v2234_v18  ;;  %1761 = vmatpush3.bf16.msra.mxu0 %v2185_v12  ;;  %v1267_v12 = vld [vmem:[%s2603_s0 + $0x38] sm:$0xff] }
 0x5c7   :  { %1766 = vmatprep.subr.bf16.mxu1 %v2008_v0  ;;  %1786 = vmatprep.subr.bf16.mxu0 %v2008_v0 }
 0x67c   :  { %v732_v1 = vpop.f32.mrb[20].mxu1  ;;  %v777_v2 = vpop.f32.mrb[24].mxu0 }
 0x67d   :  { %v733_v3 = vadd.f32 %v2287_v30, %v732_v1  ;;  %v778_v5 = vadd.f32 %v2242_v19, %v777_v2  ;;  %v1704_v7 = vpop.f32.mrb[21].mxu1  ;;  %v1724_v9 = vpop.f32.mrb[25].mxu0  ;;  %v1148_v1 = vld [vmem:[%s2613_s10 + $0x28] sm:$0xff] }
 0x67e   :  { %v735_v11 = vpop.f32.mrb[22].mxu1  ;;  %v780_v25 = vpop.f32.mrb[26].mxu0  ;;  %v1868_v2 = vpack.c.bf16 %v1148_v1, %v1147_v24  ;;  %v1151_v9 = vld [vmem:[%s2613_s10 + $0x40] sm:$0xff] }
 0x67f   :  { %1946 = vtanh.f32 %v733_v3  ;;  %v1705_v26 = vpop.f32.mrb[23].mxu1  ;;  %v1725_v27 = vpop.f32.mrb[27].mxu0  ;;  %v1149_v3 = vld [vmem:[%s2613_s10 + $0x30] sm:$0xff]  ;;  %v1152_v11 = vld [vmem:[%s2613_s10 + $0x48] sm:$0xff] }
 0x680   :  { %1948 = vtanh.f32 %v778_v5  ;;  %v1150_v5 = vld [vmem:[%s2613_s10 + $0x38] sm:$0xff]  ;;  %v1874_v25 = vpack.c.bf16 %v1152_v11, %v1151_v9  ;;  %v1153_v26 = vld [vmem:[%s2613_s10 + $0x50] sm:$0xff] }
 0x681   :  { %v1871_v7 = vpack.c.bf16 %v1150_v5, %v1149_v3  ;;  %v1154_v27 = vld [vmem:[%s2613_s10 + $0x58] sm:$0xff] }
 0x689   :  { %v1947_v28 = vpop.eup %1946 }
 0x68a   :  { %v1949_v29 = vpop.eup %1948 }
 0x68b   :  { %v784_v31 = vadd.f32 %v1949_v29, %v1947_v28  ;;  %v829_v32 = vadd.f32 %v1949_v29, %v1267_v12  ;;  %v1877_v12 = vpack.c.bf16 %v1154_v27, %v1153_v26  ;;  %v1155_v28 = vld [vmem:[%s2613_s10 + $0x60] sm:$0xff]  ;;  %v1156_v29 = vld [vmem:[%s2613_s10 + $0x68] sm:$0xff] }
 0x68d   :  { %v785_v33 = vpack.c.bf16 %v784_v31, %v784_v31  ;;  %v830_v34 = vpack.c.bf16 %v829_v32, %v829_v32  ;;  %v1880_v31 = vpack.c.bf16 %v1156_v29, %v1155_v28  ;;  %v1268_v32 = vld [vmem:[%s2610_s7] ss:$0 sm:$0xff] }
 0x68f   :  { %1743 = vmatmul.mubr.bf16.vlgmr.msra.gmra.mrb[24].mxu1 %v785_v33  ;;  %1763 = vmatmul.mubr.bf16.vlgmr.msra.gmra.mrb[28].mxu0 %v830_v34 }
 0x690   :  { %1767 = vmatpush3.bf16.msra.mxu1 %v2128_v4  ;;  %1782 = vmatprep.mubr.msk.bf16.mxu1 %vm2009_vm0, %v2008_v0  ;;  %v1908_v4 = vld [vmem:[#allocation2] sm:$0xff]  }
 0x691   :  { %1768 = vmatprep.subr.bf16.mxu1 %v2008_v0  ;;  %1802 = vmatprep.mubr.msk.bf16.mxu0 %vm2009_vm0, %v2008_v0 }
 0x692   :  { %1787 = vmatpush3.bf16.msra.mxu0 %v1908_v4 }
 0x693   :  { %1788 = vmatprep.subr.bf16.mxu0 %v2008_v0 }
 0x694   :  { %1769 = vmatpush3.bf16.msra.mxu1 %v2141_v6  ;;  %v1909_v6 = vld [vmem:[#allocation2 + $0x8] sm:$0xff]  }
 0x695   :  { %1770 = vmatprep.subr.bf16.mxu1 %v2008_v0 }
 0x696   :  { %1789 = vmatpush3.bf16.msra.mxu0 %v1909_v6 }
 0x697   :  { %1790 = vmatprep.subr.bf16.mxu0 %v2008_v0 }
 0x698   :  { %1771 = vmatpush3.bf16.msra.mxu1 %v2152_v8  ;;  %v1910_v8 = vld [vmem:[#allocation2 + $0x10] sm:$0xff]  }
 0x699   :  { %1772 = vmatprep.subr.bf16.mxu1 %v2008_v0 }
 0x69a   :  { %1791 = vmatpush3.bf16.msra.mxu0 %v1910_v8 }
 0x69b   :  { %1792 = vmatprep.subr.bf16.mxu0 %v2008_v0 }
 0x69c   :  { %1773 = vmatpush3.bf16.msra.mxu1 %v2166_v10  ;;  %v1911_v10 = vld [vmem:[#allocation2 + $0x18] sm:$0xff]  }
 0x69d   :  { %1774 = vmatprep.subr.bf16.mxu1 %v2008_v0 }
 0x69e   :  { %1793 = vmatpush3.bf16.msra.mxu0 %v1911_v10 }
 0x69f   :  { %1794 = vmatprep.subr.bf16.mxu0 %v2008_v0 }
 0x6a0   :  { %1775 = vmatpush3.bf16.msra.mxu1 %v2214_v15 }
 0x6a1   :  { %1776 = vmatprep.subr.bf16.mxu1 %v2008_v0 }
 0x6a2   :  { %1795 = vmatpush3.bf16.msra.mxu0 %v1912_v45 }
 0x6a3   :  { %1796 = vmatprep.subr.bf16.mxu0 %v2008_v0 }
 0x6a4   :  { %1777 = vmatpush3.bf16.msra.mxu1 %v2221_v16 }
 0x6a5   :  { %1778 = vmatprep.subr.bf16.mxu1 %v2008_v0 }
 0x6a6   :  { %1797 = vmatpush3.bf16.msra.mxu0 %v1913_v46 }
 0x6a7   :  { %1798 = vmatprep.subr.bf16.mxu0 %v2008_v0 }
 0x6a8   :  { %1779 = vmatpush3.bf16.msra.mxu1 %v2227_v17 }
 0x6a9   :  { %1780 = vmatprep.subr.bf16.mxu1 %v2008_v0 }
 0x6ac   :  { %1781 = vmatpush3.bf16.msra.mxu1 %v2234_v18 }
 0x6ad   :  { %1806 = vmatprep.subr.bf16.mxu1 %v2008_v0 }
 0x762   :  { %v820_v15 = vpop.f32.mrb[24].mxu1  ;;  %v865_v16 = vpop.f32.mrb[28].mxu0 }
 0x763   :  { %v821_v17 = vadd.f32 %v2287_v30, %v820_v15  ;;  %v866_v18 = vadd.f32 %v2242_v19, %v865_v16  ;;  %v1744_v35 = vpop.f32.mrb[25].mxu1  ;;  %v1764_v36 = vpop.f32.mrb[29].mxu0  ;;  %v1914_v19 = vld [vmem:[#allocation2 + $0x30] sm:$0xff]  }
 0x764   :  { %v823_v37 = vpop.f32.mrb[26].mxu1  ;;  %v868_v38 = vpop.f32.mrb[30].mxu0  ;;  %1799 = vmatpush3.bf16.msra.mxu0 %v1914_v19  ;;  %v1157_v16 = vld [vmem:[%s2613_s10 + $0x70] sm:$0xff]  ;;  %v1277_v35 = vld [vmem:[%s2612_s9] ss:$0 sm:$0xff] }
 0x765   :  { %1950 = vtanh.f32 %v821_v17  ;;  %v1745_v39 = vpop.f32.mrb[27].mxu1  ;;  %v1765_v40 = vpop.f32.mrb[31].mxu0  ;;  %1800 = vmatprep.subr.bf16.mxu0 %v2008_v0  ;;  %v1158_v17 = vld [vmem:[%s2613_s10 + $0x78] sm:$0xff] }
 0x766   :  { %1952 = vtanh.f32 %v866_v18  ;;  %v1883_v18 = vpack.c.bf16 %v1158_v17, %v1157_v16 }
 0x768   :  { %1801 = vmatpush3.bf16.msra.mxu0 %v1915_v47 }
 0x769   :  { %1861 = vmatprep.subr.bf16.mxu0 %v2010_v21 }
 0x76f   :  { %v1951_v41 = vpop.eup %1950 }
 0x770   :  { %v1953_v42 = vpop.eup %1952 }
 0x771   :  { %v872_v43 = vadd.f32 %v1953_v42, %v1951_v41  ;;  %v1286_v42 = vld [vmem:[%s2614_s11] ss:$0 sm:$0xff] }
 0x773   :  { %v873_v44 = vpack.c.bf16 %v872_v43, %v872_v43 }
 0x775   :  { %1783 = vmatmul.mubr.bf16.vlgmr.msra.gmra.mrb[28].mxu1 %v873_v44 }
 0x776   :  { %1822 = vmatprep.mubr.msk.bf16.mxu1 %vm2009_vm0, %v2008_v0  ;;  %1807 = vmatpush3.bf16.msra.mxu1 %v1916_v48 }
 0x777   :  { %1808 = vmatprep.subr.bf16.mxu1 %v2008_v0 }
 0x77a   :  { %1809 = vmatpush3.bf16.msra.mxu1 %v1917_v49 }
 0x77b   :  { %1810 = vmatprep.subr.bf16.mxu1 %v2008_v0 }
 0x77e   :  { %1811 = vmatpush3.bf16.msra.mxu1 %v1918_v50 }
 0x77f   :  { %1812 = vmatprep.subr.bf16.mxu1 %v2008_v0 }
 0x782   :  { %1813 = vmatpush3.bf16.msra.mxu1 %v1919_v51 }
 0x783   :  { %1814 = vmatprep.subr.bf16.mxu1 %v2008_v0 }
 0x786   :  { %1815 = vmatpush3.bf16.msra.mxu1 %v1920_v52 }
 0x787   :  { %1816 = vmatprep.subr.bf16.mxu1 %v2008_v0 }
 0x78a   :  { %1817 = vmatpush3.bf16.msra.mxu1 %v1921_v53 }
 0x78b   :  { %1818 = vmatprep.subr.bf16.mxu1 %v2008_v0 }
 0x78e   :  { %1819 = vmatpush3.bf16.msra.mxu1 %v1922_v63 }
 0x78f   :  { %1820 = vmatprep.subr.bf16.mxu1 %v2008_v0 }
 0x848   :  { %v908_v54 = vpop.f32.mrb[28].mxu1 }
 0x849   :  { %v909_v55 = vadd.f32 %v2287_v30, %v908_v54  ;;  %v1784_v56 = vpop.f32.mrb[29].mxu1  ;;  %v1923_v30 = vld [vmem:[#allocation4 + $0x38] sm:$0xff]  }
 0x84a   :  { %v911_v57 = vpop.f32.mrb[30].mxu1  ;;  %1821 = vmatpush3.bf16.msra.mxu1 %v1923_v30 }
 0x84b   :  { %1954 = vtanh.f32 %v909_v55  ;;  %v1785_v58 = vpop.f32.mrb[31].mxu1 }
 0x855   :  { %v1955_v60 = vpop.eup %1954 }
 0x856   :  { %v916_v61 = vadd.f32 %v1955_v60, %v915_v59 }
 0x858   :  { %v917_v62 = vpack.c.bf16 %v916_v61, %v916_v61 }
 0x85a   :  { %1803 = vmatmul.mubr.bf16.vlgmr.msra.gmra.mrb[32].mxu0 %v917_v62 }
 0x85b   :  { %1858 = vmatprep.mubr.msk.f32.mxu0 %vm2009_vm0, %v2008_v0  ;;  %v1146_v0 = vld [vmem:[%s2613_s10 + $0x18] sm:$0xff]  ;;  %1863 = vmatpush3.bf16.msra.mxu0 %v1862_v22 }
 0x85c   :  { %v1865_v23 = vpack.c.bf16 %v1146_v0, %v1145_v20  ;;  %1864 = vmatprep.subr.bf16.mxu0 %v2010_v21 }
 0x85f   :  { %1866 = vmatpush3.bf16.msra.mxu0 %v1865_v23 }
 0x860   :  { %1867 = vmatprep.subr.bf16.mxu0 %v2010_v21 }
 0x863   :  { %1869 = vmatpush3.bf16.msra.mxu0 %v1868_v2 }
 0x864   :  { %1870 = vmatprep.subr.bf16.mxu0 %v2010_v21 }
 0x867   :  { %1872 = vmatpush3.bf16.msra.mxu0 %v1871_v7 }
 0x868   :  { %1873 = vmatprep.subr.bf16.mxu0 %v2010_v21 }
 0x86b   :  { %1875 = vmatpush3.bf16.msra.mxu0 %v1874_v25 }
 0x86c   :  { %1876 = vmatprep.subr.bf16.mxu0 %v2010_v21 }
 0x86f   :  { %1878 = vmatpush3.bf16.msra.mxu0 %v1877_v12 }
 0x870   :  { %1879 = vmatprep.subr.bf16.mxu0 %v2010_v21 }
 0x873   :  { %1881 = vmatpush3.bf16.msra.mxu0 %v1880_v31 }
 0x874   :  { %1882 = vmatprep.subr.bf16.mxu0 %v2010_v21 }
 0x877   :  { %1884 = vmatpush3.bf16.msra.mxu0 %v1883_v18 }
 0x92d   :  { %v1023_v33 = vpop.f32.mrb[32].mxu0 }
 0x92e   :  { %v1024_v34 = vadd.f32 %v1268_v32, %v1023_v33  ;;  %v1804_v4 = vpop.f32.mrb[33].mxu0 }
 0x92f   :  { %v1026_v6 = vpop.f32.mrb[34].mxu0 }
 0x930   :  { %v1029_v8 = vmax.f32 %v1024_v34, 0.0  ;;  %v1805_v10 = vpop.f32.mrb[35].mxu0 }
 0x932   :  { %v1030_v15 = vpack.c.bf16 %v1029_v8, %v1029_v8 }
 0x934   :  { %1823 = vmatmul.mubr.bf16.vlgmr.msra.gmra.mrb[32].mxu1 %v1030_v15 }
 0xa07   :  { %v1136_v36 = vpop.f32.mrb[32].mxu1 }
 0xa08   :  { %v1137_v37 = vadd.f32 %v1277_v35, %v1136_v36  ;;  %v1824_v38 = vpop.f32.mrb[33].mxu1 }
 0xa09   :  { %v1139_v39 = vpop.f32.mrb[34].mxu1 }
 0xa0a   :  { %v1142_v40 = vmax.f32 %v1137_v37, 0.0  ;;  %v1825_v41 = vpop.f32.mrb[35].mxu1 }
 0xa0c   :  { %1859 = vmatmul.mubr.f32.vlgmr.msra.gmra.mrb[36].mxu0 %v1142_v40 }
 0xadf   :  { %v1232_v43 = vpop.f32.mrb[36].mxu0 }
 0xae0   :  { %v1233_v44 = vadd.f32 %v1286_v42, %v1232_v43  ;;  %v1860_v45 = vpop.f32.mrb[37].mxu0 }
 0xae2   :  { %1236 = vst [vmem:[%s2615_s12] sm:$0xff] %v1233_v44 }
 0xae3   :  { %1241 = vsyncpa [#allocation3], 1 }
 0xae4   :  { %1242 = vsyncpa [#allocation5], 1 }

</bundles_post_ra>
